<compile_context>
chip_gen: v5e
topology: v5e:2x2
jax: 0.10.0
libtpu: 0.0.40
codegen_flags: <defaults>
</compile_context>

<pallas_src>
import functools

import jax
import jax.numpy as jnp
from jax.experimental import pallas as pl
from jax.experimental.pallas import tpu as pltpu

IN_FEATS = 28 * 28          # 784
IN_PAD = 896                # 7 * 128, lane-exact fc1 contraction dim
HMAX = 128                  # lane width of the activation tile carried through the chain
TAIL_K = 32                 # max fan_in of the 31 tail layers (all <= 32)
BPAD = 8                    # pad batch to one sublane tile

# Head-slab row offsets (all multiples of 16 -> clean bf16 sublane tiles).
W1_ROW, W2_ROW, W3_ROW = 0, IN_PAD, IN_PAD + 128
HEAD_ROWS = IN_PAD + 128 + 64          # 1088


def _calculate_layer_sizes(start_size, num_layers):
    """Mirror of SimpleNN._calculate_layer_sizes."""
    if num_layers == 0:
        return [start_size]
    min_size = max(8, 10)
    sizes = [start_size]
    if num_layers == 1:
        sizes.append(min_size)
    else:
        step = max(1, (start_size - min_size) // num_layers)
        for i in range(1, num_layers + 1):
            sizes.append(max(min_size, start_size - step * i))
    return sizes


def _build_params(key, num_additional_layers=30, hidden_size=32):
    """Deterministic PyTorch-style (uniform +-1/sqrt(fan_in)) init, bf16 slab storage."""
    sizes = _calculate_layer_sizes(hidden_size, num_additional_layers)

    # (fan_in, fan_out, relu_after) for every linear layer in forward order.
    layer_defs = [(IN_FEATS, 128, True), (128, 64, True), (64, hidden_size, False)]
    for i in range(num_additional_layers):
        layer_defs.append((sizes[i], sizes[i + 1], True))
    layer_defs.append((sizes[-1], 10, False))

    keys = jax.random.split(key, 2 * len(layer_defs))

    def linear_init(kw, kb, fan_in, fan_out):
        bound = 1.0 / (fan_in ** 0.5)
        w = jax.random.uniform(kw, (fan_in, fan_out), jnp.float32, -bound, bound)
        b = jax.random.uniform(kb, (fan_out,), jnp.float32, -bound, bound)
        return w, b

    n_tail = num_additional_layers + 1                    # 30 additional + output = 31

    # --- head slab: w1 | w2 | w3, all padded to 128 lanes, pads exactly 0 ---
    w1, b1 = linear_init(keys[0], keys[1], IN_FEATS, 128)
    w2, b2 = linear_init(keys[2], keys[3], 128, 64)
    w3, b3 = linear_init(keys[4], keys[5], 64, hidden_size)

    whead = jnp.zeros((HEAD_ROWS, HMAX), jnp.float32)
    whead = whead.at[W1_ROW:W1_ROW + IN_FEATS, :128].set(w1)
    whead = whead.at[W2_ROW:W2_ROW + 128, :64].set(w2)
    whead = whead.at[W3_ROW:W3_ROW + 64, :hidden_size].set(w3)

    # --- bias slab: one 128-lane row per layer, pads exactly 0 ---
    bias = jnp.zeros((3 + n_tail, HMAX), jnp.float32)
    bias = bias.at[0, :128].set(b1)
    bias = bias.at[1, :64].set(b2)
    bias = bias.at[2, :hidden_size].set(b3)

    # --- tail slab: 31 layers x 32 rows x 128 lanes, pads exactly 0 ---
    wtail = jnp.zeros((n_tail * TAIL_K, HMAX), jnp.float32)
    tail_relu = []
    for li, (fi, fo, relu) in enumerate(layer_defs[3:], start=3):
        assert fi <= TAIL_K and fo <= HMAX
        w, b = linear_init(keys[2 * li], keys[2 * li + 1], fi, fo)
        t = li - 3
        wtail = wtail.at[t * TAIL_K:t * TAIL_K + fi, :fo].set(w)
        bias = bias.at[3 + t, :fo].set(b)
        tail_relu.append(bool(relu))

    bf16 = jnp.bfloat16
    return dict(
        whead=whead.astype(bf16),          # (1088, 128) bf16  ~272 KiB
        bias=bias.astype(bf16),            # (34, 128)   bf16  ~8.5 KiB
        wtail=wtail.astype(bf16),          # (992, 128)  bf16  ~248 KiB
        tail_relu=tuple(tail_relu),        # static Python flags
        layer_defs=layer_defs,
    )


def mlp_kernel(x_ref, whead_ref, bias_ref, wtail_hbm, out_ref,
               wtail_vmem, dma_sem, *, tail_relu):
    f32 = jnp.float32
    bf16 = jnp.bfloat16

    # Kick off the tail-weight DMA (HBM -> VMEM scratch); it overlaps with fc1-fc3.
    tail_cp = pltpu.make_async_copy(wtail_hbm, wtail_vmem, dma_sem)
    tail_cp.start()

    # fc1 + ReLU: (8, 896) f32 @ (896, 128) bf16 -> f32 acc (x kept in f32 for accuracy).
    w1 = whead_ref[pl.ds(W1_ROW, IN_PAD), :]
    h = jnp.dot(x_ref[...], w1, preferred_element_type=f32)
    h = jnp.maximum(h + bias_ref[pl.ds(0, 1), :].astype(f32), 0.0)

    # fc2 + ReLU: (8, 128) @ (128, 128); real fan_out = 64, padded lanes stay 0.
    w2 = whead_ref[pl.ds(W2_ROW, 128), :]
    h = jnp.dot(h.astype(bf16), w2, preferred_element_type=f32)
    h = jnp.maximum(h + bias_ref[pl.ds(1, 1), :].astype(f32), 0.0)

    # fc3 (no ReLU): (8, 64) @ (64, 128); real fan_out = 32.
    w3 = whead_ref[pl.ds(W3_ROW, 64), :]
    h = jnp.dot(h[:, :64].astype(bf16), w3, preferred_element_type=f32)
    h = h + bias_ref[pl.ds(2, 1), :].astype(f32)

    # Tail weights must be resident from here on.
    tail_cp.wait()

    # 30 additional layers (+ReLU) and the output layer (no ReLU), fully unrolled.
    # All fan_in <= 32; padded rows/cols/lanes are exactly 0 (see header invariant).
    for i in range(len(tail_relu)):
        w = wtail_vmem[pl.ds(i * TAIL_K, TAIL_K), :]           # (32, 128) bf16, static offset
        b = bias_ref[pl.ds(3 + i, 1), :].astype(f32)           # (1, 128)
        h = jnp.dot(h[:, :TAIL_K].astype(bf16), w, preferred_element_type=f32) + b
        if tail_relu[i]:
            h = jnp.maximum(h, 0.0)

    out_ref[...] = h


@functools.partial(jax.jit, static_argnames=("tail_relu",))
def _forward_jit(x, whead, bias, wtail, tail_relu):
    B = x.shape[0]
    x_flat = x.reshape(B, -1).astype(jnp.float32)              # nn.Flatten
    x_pad = jnp.zeros((BPAD, IN_PAD), jnp.float32).at[:B, :IN_FEATS].set(x_flat)

    vmem = pl.BlockSpec(memory_space=pltpu.MemorySpace.VMEM)
    n_tail = len(tail_relu)

    out = pl.pallas_call(
        functools.partial(mlp_kernel, tail_relu=tail_relu),
        out_shape=jax.ShapeDtypeStruct((BPAD, HMAX), jnp.float32),
        in_specs=[vmem,                                   # x_pad
                  vmem,                                   # whead slab
                  vmem,                                   # bias slab
                  pl.BlockSpec(memory_space=pl.ANY)],     # wtail slab stays in HBM
        out_specs=vmem,
        scratch_shapes=[pltpu.VMEM((n_tail * TAIL_K, HMAX), jnp.bfloat16),
                        pltpu.SemaphoreType.DMA(())],
    )(x_pad, whead, bias, wtail)

    return out[:B, :10]


def simple_nn_forward(x, params):
    """x: (B, 1, 28, 28) float32 (NCHW). Returns (B, 10) logits (float32)."""
    assert x.shape[0] <= BPAD
    return _forward_jit(x, params["whead"], params["bias"], params["wtail"],
                        params["tail_relu"])


def simple_nn_reference(x, params):
    """Pure-JAX f32 reference using the same (bf16-stored) slab weights."""
    B = x.shape[0]
    h = x.reshape(B, -1).astype(jnp.float32)
    defs = params["layer_defs"]
    whead = params["whead"].astype(jnp.float32)
    bias = params["bias"].astype(jnp.float32)
    wtail = params["wtail"].astype(jnp.float32)

    fi, fo, _ = defs[0]
    h = jnp.maximum(h @ whead[W1_ROW:W1_ROW + fi, :fo] + bias[0, :fo], 0.0)
    fi, fo, _ = defs[1]
    h = jnp.maximum(h @ whead[W2_ROW:W2_ROW + fi, :fo] + bias[1, :fo], 0.0)
    fi, fo, _ = defs[2]
    h = h @ whead[W3_ROW:W3_ROW + fi, :fo] + bias[2, :fo]

    for t, (fi, fo, relu) in enumerate(defs[3:]):
        w = wtail[t * TAIL_K:t * TAIL_K + fi, :fo]
        b = bias[3 + t, :fo]
        h = h @ w + b
        if relu:
            h = jnp.maximum(h, 0.0)
    return h


if __name__ == "__main__":
    key = jax.random.PRNGKey(0)
    kp, kx = jax.random.split(key)

    params = _build_params(kp, num_additional_layers=30, hidden_size=32)

    # MNIST-like NCHW input, small batch.
    x = jax.random.normal(kx, (2, 1, 28, 28), jnp.float32)

    out = jax.block_until_ready(simple_nn_forward(x, params))
    ref = simple_nn_reference(x, params)

    assert out.shape == (2, 10), out.shape
    # bf16 weight storage + bf16 activation casts at MXU inputs (layers >= fc2) ->
    # loosened tolerance; reference runs the same bf16-quantized weights in f32.
    assert jnp.allclose(out, ref, atol=2e-2, rtol=2e-2), (
        f"mismatch vs reference: max abs diff {jnp.max(jnp.abs(out - ref))}")

    print("KERNEL_OK")
</pallas_src>

<mosaic_0001>
module attributes {stable_mosaic.version = 11 : i64} {
  func.func @mlp_kernel(%arg0: memref<8x896xf32, #tpu.memory_space<vmem>>, %arg1: memref<1088x128xbf16, #tpu.memory_space<vmem>>, %arg2: memref<34x128xbf16, #tpu.memory_space<vmem>>, %arg3: memref<992x128xbf16, #tpu.memory_space<any>>, %arg4: memref<8x128xf32, #tpu.memory_space<vmem>>, %arg5: memref<992x128xbf16, #tpu.memory_space<vmem>>, %arg6: memref<!tpu.dma_semaphore, #tpu.memory_space<semaphore_mem>>) attributes {dimension_semantics = [], scalar_prefetch = 0 : i64, scratch_operands = 2 : i64, tpu.core_type = #tpu.core_type<tc>} {
    tpu.enqueue_dma source(%arg3 : memref<992x128xbf16, #tpu.memory_space<any>>) target(%arg5 : memref<992x128xbf16, #tpu.memory_space<vmem>>) target_semaphore(%arg6 : memref<!tpu.dma_semaphore, #tpu.memory_space<semaphore_mem>>)
    %c0 = arith.constant 0 : index
    %c0_0 = arith.constant 0 : index
    %0 = vector.load %arg1[%c0, %c0_0] : memref<1088x128xbf16, #tpu.memory_space<vmem>>, vector<896x128xbf16>
    %c0_1 = arith.constant 0 : index
    %c0_2 = arith.constant 0 : index
    %1 = vector.load %arg0[%c0_1, %c0_2] : memref<8x896xf32, #tpu.memory_space<vmem>>, vector<8x896xf32>
    %cst = arith.constant dense<0.000000e+00> : vector<8x128xf32>
    %2 = tpu.matmul %1, %0, %cst {dimension_numbers = #tpu.dot_dimension_numbers<[1], [0], [0], [1], [0, 0, 1, 1], [], []>} : vector<8x896xf32>, vector<896x128xbf16>, vector<8x128xf32> -> vector<8x128xf32>
    %c0_3 = arith.constant 0 : index
    %c0_4 = arith.constant 0 : index
    %3 = vector.load %arg2[%c0_3, %c0_4] : memref<34x128xbf16, #tpu.memory_space<vmem>>, vector<1x128xbf16>
    %4 = arith.extf %3 : vector<1x128xbf16> to vector<1x128xf32>
    %5 = vector.broadcast %4 : vector<1x128xf32> to vector<8x128xf32>
    %6 = arith.addf %2, %5 : vector<8x128xf32>
    %cst_5 = arith.constant 0.000000e+00 : f32
    %7 = vector.broadcast %cst_5 : f32 to vector<8x128xf32>
    %8 = arith.maximumf %6, %7 : vector<8x128xf32>
    %c896 = arith.constant 896 : index
    %c0_6 = arith.constant 0 : index
    %9 = vector.load %arg1[%c896, %c0_6] : memref<1088x128xbf16, #tpu.memory_space<vmem>>, vector<128x128xbf16>
    %10 = arith.truncf %8 : vector<8x128xf32> to vector<8x128xbf16>
    %cst_7 = arith.constant dense<0.000000e+00> : vector<8x128xf32>
    %11 = tpu.matmul %10, %9, %cst_7 {dimension_numbers = #tpu.dot_dimension_numbers<[1], [0], [0], [1], [0, 0, 1, 1], [], []>} : vector<8x128xbf16>, vector<128x128xbf16>, vector<8x128xf32> -> vector<8x128xf32>
    %c1 = arith.constant 1 : index
    %c0_8 = arith.constant 0 : index
    %12 = vector.load %arg2[%c1, %c0_8] : memref<34x128xbf16, #tpu.memory_space<vmem>>, vector<1x128xbf16>
    %13 = arith.extf %12 : vector<1x128xbf16> to vector<1x128xf32>
    %14 = vector.broadcast %13 : vector<1x128xf32> to vector<8x128xf32>
    %15 = arith.addf %11, %14 : vector<8x128xf32>
    %cst_9 = arith.constant 0.000000e+00 : f32
    %16 = vector.broadcast %cst_9 : f32 to vector<8x128xf32>
    %17 = arith.maximumf %15, %16 : vector<8x128xf32>
    %c1024 = arith.constant 1024 : index
    %c0_10 = arith.constant 0 : index
    %18 = vector.load %arg1[%c1024, %c0_10] : memref<1088x128xbf16, #tpu.memory_space<vmem>>, vector<64x128xbf16>
    %19 = vector.extract_strided_slice %17 {offsets = [0, 0], sizes = [8, 64], strides = [1, 1]} : vector<8x128xf32> to vector<8x64xf32>
    %20 = arith.truncf %19 : vector<8x64xf32> to vector<8x64xbf16>
    %cst_11 = arith.constant dense<0.000000e+00> : vector<8x128xf32>
    %21 = tpu.matmul %20, %18, %cst_11 {dimension_numbers = #tpu.dot_dimension_numbers<[1], [0], [0], [1], [0, 0, 1, 1], [], []>} : vector<8x64xbf16>, vector<64x128xbf16>, vector<8x128xf32> -> vector<8x128xf32>
    %c2 = arith.constant 2 : index
    %c0_12 = arith.constant 0 : index
    %22 = vector.load %arg2[%c2, %c0_12] : memref<34x128xbf16, #tpu.memory_space<vmem>>, vector<1x128xbf16>
    %23 = arith.extf %22 : vector<1x128xbf16> to vector<1x128xf32>
    %24 = vector.broadcast %23 : vector<1x128xf32> to vector<8x128xf32>
    %25 = arith.addf %21, %24 : vector<8x128xf32>
    tpu.wait_dma2 semaphore(%arg6 : memref<!tpu.dma_semaphore, #tpu.memory_space<semaphore_mem>>) src(%arg3 : memref<992x128xbf16, #tpu.memory_space<any>>) dst(%arg5 : memref<992x128xbf16, #tpu.memory_space<vmem>>)
    %c0_13 = arith.constant 0 : index
    %c0_14 = arith.constant 0 : index
    %26 = vector.load %arg5[%c0_13, %c0_14] : memref<992x128xbf16, #tpu.memory_space<vmem>>, vector<32x128xbf16>
    %c3 = arith.constant 3 : index
    %c0_15 = arith.constant 0 : index
    %27 = vector.load %arg2[%c3, %c0_15] : memref<34x128xbf16, #tpu.memory_space<vmem>>, vector<1x128xbf16>
    %28 = arith.extf %27 : vector<1x128xbf16> to vector<1x128xf32>
    %29 = vector.extract_strided_slice %25 {offsets = [0, 0], sizes = [8, 32], strides = [1, 1]} : vector<8x128xf32> to vector<8x32xf32>
    %30 = arith.truncf %29 : vector<8x32xf32> to vector<8x32xbf16>
    %cst_16 = arith.constant dense<0.000000e+00> : vector<8x128xf32>
    %31 = tpu.matmul %30, %26, %cst_16 {dimension_numbers = #tpu.dot_dimension_numbers<[1], [0], [0], [1], [0, 0, 1, 1], [], []>} : vector<8x32xbf16>, vector<32x128xbf16>, vector<8x128xf32> -> vector<8x128xf32>
    %32 = vector.broadcast %28 : vector<1x128xf32> to vector<8x128xf32>
    %33 = arith.addf %31, %32 : vector<8x128xf32>
    %cst_17 = arith.constant 0.000000e+00 : f32
    %34 = vector.broadcast %cst_17 : f32 to vector<8x128xf32>
    %35 = arith.maximumf %33, %34 : vector<8x128xf32>
    %c32 = arith.constant 32 : index
    %c0_18 = arith.constant 0 : index
    %36 = vector.load %arg5[%c32, %c0_18] : memref<992x128xbf16, #tpu.memory_space<vmem>>, vector<32x128xbf16>
    %c4 = arith.constant 4 : index
    %c0_19 = arith.constant 0 : index
    %37 = vector.load %arg2[%c4, %c0_19] : memref<34x128xbf16, #tpu.memory_space<vmem>>, vector<1x128xbf16>
    %38 = arith.extf %37 : vector<1x128xbf16> to vector<1x128xf32>
    %39 = vector.extract_strided_slice %35 {offsets = [0, 0], sizes = [8, 32], strides = [1, 1]} : vector<8x128xf32> to vector<8x32xf32>
    %40 = arith.truncf %39 : vector<8x32xf32> to vector<8x32xbf16>
    %cst_20 = arith.constant dense<0.000000e+00> : vector<8x128xf32>
    %41 = tpu.matmul %40, %36, %cst_20 {dimension_numbers = #tpu.dot_dimension_numbers<[1], [0], [0], [1], [0, 0, 1, 1], [], []>} : vector<8x32xbf16>, vector<32x128xbf16>, vector<8x128xf32> -> vector<8x128xf32>
    %42 = vector.broadcast %38 : vector<1x128xf32> to vector<8x128xf32>
    %43 = arith.addf %41, %42 : vector<8x128xf32>
    %cst_21 = arith.constant 0.000000e+00 : f32
    %44 = vector.broadcast %cst_21 : f32 to vector<8x128xf32>
    %45 = arith.maximumf %43, %44 : vector<8x128xf32>
    %c64 = arith.constant 64 : index
    %c0_22 = arith.constant 0 : index
    %46 = vector.load %arg5[%c64, %c0_22] : memref<992x128xbf16, #tpu.memory_space<vmem>>, vector<32x128xbf16>
    %c5 = arith.constant 5 : index
    %c0_23 = arith.constant 0 : index
    %47 = vector.load %arg2[%c5, %c0_23] : memref<34x128xbf16, #tpu.memory_space<vmem>>, vector<1x128xbf16>
    %48 = arith.extf %47 : vector<1x128xbf16> to vector<1x128xf32>
    %49 = vector.extract_strided_slice %45 {offsets = [0, 0], sizes = [8, 32], strides = [1, 1]} : vector<8x128xf32> to vector<8x32xf32>
    %50 = arith.truncf %49 : vector<8x32xf32> to vector<8x32xbf16>
    %cst_24 = arith.constant dense<0.000000e+00> : vector<8x128xf32>
    %51 = tpu.matmul %50, %46, %cst_24 {dimension_numbers = #tpu.dot_dimension_numbers<[1], [0], [0], [1], [0, 0, 1, 1], [], []>} : vector<8x32xbf16>, vector<32x128xbf16>, vector<8x128xf32> -> vector<8x128xf32>
    %52 = vector.broadcast %48 : vector<1x128xf32> to vector<8x128xf32>
    %53 = arith.addf %51, %52 : vector<8x128xf32>
    %cst_25 = arith.constant 0.000000e+00 : f32
    %54 = vector.broadcast %cst_25 : f32 to vector<8x128xf32>
    %55 = arith.maximumf %53, %54 : vector<8x128xf32>
    %c96 = arith.constant 96 : index
    %c0_26 = arith.constant 0 : index
    %56 = vector.load %arg5[%c96, %c0_26] : memref<992x128xbf16, #tpu.memory_space<vmem>>, vector<32x128xbf16>
    %c6 = arith.constant 6 : index
    %c0_27 = arith.constant 0 : index
    %57 = vector.load %arg2[%c6, %c0_27] : memref<34x128xbf16, #tpu.memory_space<vmem>>, vector<1x128xbf16>
    %58 = arith.extf %57 : vector<1x128xbf16> to vector<1x128xf32>
    %59 = vector.extract_strided_slice %55 {offsets = [0, 0], sizes = [8, 32], strides = [1, 1]} : vector<8x128xf32> to vector<8x32xf32>
    %60 = arith.truncf %59 : vector<8x32xf32> to vector<8x32xbf16>
    %cst_28 = arith.constant dense<0.000000e+00> : vector<8x128xf32>
    %61 = tpu.matmul %60, %56, %cst_28 {dimension_numbers = #tpu.dot_dimension_numbers<[1], [0], [0], [1], [0, 0, 1, 1], [], []>} : vector<8x32xbf16>, vector<32x128xbf16>, vector<8x128xf32> -> vector<8x128xf32>
    %62 = vector.broadcast %58 : vector<1x128xf32> to vector<8x128xf32>
    %63 = arith.addf %61, %62 : vector<8x128xf32>
    %cst_29 = arith.constant 0.000000e+00 : f32
    %64 = vector.broadcast %cst_29 : f32 to vector<8x128xf32>
    %65 = arith.maximumf %63, %64 : vector<8x128xf32>
    %c128 = arith.constant 128 : index
    %c0_30 = arith.constant 0 : index
    %66 = vector.load %arg5[%c128, %c0_30] : memref<992x128xbf16, #tpu.memory_space<vmem>>, vector<32x128xbf16>
    %c7 = arith.constant 7 : index
    %c0_31 = arith.constant 0 : index
    %67 = vector.load %arg2[%c7, %c0_31] : memref<34x128xbf16, #tpu.memory_space<vmem>>, vector<1x128xbf16>
    %68 = arith.extf %67 : vector<1x128xbf16> to vector<1x128xf32>
    %69 = vector.extract_strided_slice %65 {offsets = [0, 0], sizes = [8, 32], strides = [1, 1]} : vector<8x128xf32> to vector<8x32xf32>
    %70 = arith.truncf %69 : vector<8x32xf32> to vector<8x32xbf16>
    %cst_32 = arith.constant dense<0.000000e+00> : vector<8x128xf32>
    %71 = tpu.matmul %70, %66, %cst_32 {dimension_numbers = #tpu.dot_dimension_numbers<[1], [0], [0], [1], [0, 0, 1, 1], [], []>} : vector<8x32xbf16>, vector<32x128xbf16>, vector<8x128xf32> -> vector<8x128xf32>
    %72 = vector.broadcast %68 : vector<1x128xf32> to vector<8x128xf32>
    %73 = arith.addf %71, %72 : vector<8x128xf32>
    %cst_33 = arith.constant 0.000000e+00 : f32
    %74 = vector.broadcast %cst_33 : f32 to vector<8x128xf32>
    %75 = arith.maximumf %73, %74 : vector<8x128xf32>
    %c160 = arith.constant 160 : index
    %c0_34 = arith.constant 0 : index
    %76 = vector.load %arg5[%c160, %c0_34] : memref<992x128xbf16, #tpu.memory_space<vmem>>, vector<32x128xbf16>
    %c8 = arith.constant 8 : index
    %c0_35 = arith.constant 0 : index
    %77 = vector.load %arg2[%c8, %c0_35] : memref<34x128xbf16, #tpu.memory_space<vmem>>, vector<1x128xbf16>
    %78 = arith.extf %77 : vector<1x128xbf16> to vector<1x128xf32>
    %79 = vector.extract_strided_slice %75 {offsets = [0, 0], sizes = [8, 32], strides = [1, 1]} : vector<8x128xf32> to vector<8x32xf32>
    %80 = arith.truncf %79 : vector<8x32xf32> to vector<8x32xbf16>
    %cst_36 = arith.constant dense<0.000000e+00> : vector<8x128xf32>
    %81 = tpu.matmul %80, %76, %cst_36 {dimension_numbers = #tpu.dot_dimension_numbers<[1], [0], [0], [1], [0, 0, 1, 1], [], []>} : vector<8x32xbf16>, vector<32x128xbf16>, vector<8x128xf32> -> vector<8x128xf32>
    %82 = vector.broadcast %78 : vector<1x128xf32> to vector<8x128xf32>
    %83 = arith.addf %81, %82 : vector<8x128xf32>
    %cst_37 = arith.constant 0.000000e+00 : f32
    %84 = vector.broadcast %cst_37 : f32 to vector<8x128xf32>
    %85 = arith.maximumf %83, %84 : vector<8x128xf32>
    %c192 = arith.constant 192 : index
    %c0_38 = arith.constant 0 : index
    %86 = vector.load %arg5[%c192, %c0_38] : memref<992x128xbf16, #tpu.memory_space<vmem>>, vector<32x128xbf16>
    %c9 = arith.constant 9 : index
    %c0_39 = arith.constant 0 : index
    %87 = vector.load %arg2[%c9, %c0_39] : memref<34x128xbf16, #tpu.memory_space<vmem>>, vector<1x128xbf16>
    %88 = arith.extf %87 : vector<1x128xbf16> to vector<1x128xf32>
    %89 = vector.extract_strided_slice %85 {offsets = [0, 0], sizes = [8, 32], strides = [1, 1]} : vector<8x128xf32> to vector<8x32xf32>
    %90 = arith.truncf %89 : vector<8x32xf32> to vector<8x32xbf16>
    %cst_40 = arith.constant dense<0.000000e+00> : vector<8x128xf32>
    %91 = tpu.matmul %90, %86, %cst_40 {dimension_numbers = #tpu.dot_dimension_numbers<[1], [0], [0], [1], [0, 0, 1, 1], [], []>} : vector<8x32xbf16>, vector<32x128xbf16>, vector<8x128xf32> -> vector<8x128xf32>
    %92 = vector.broadcast %88 : vector<1x128xf32> to vector<8x128xf32>
    %93 = arith.addf %91, %92 : vector<8x128xf32>
    %cst_41 = arith.constant 0.000000e+00 : f32
    %94 = vector.broadcast %cst_41 : f32 to vector<8x128xf32>
    %95 = arith.maximumf %93, %94 : vector<8x128xf32>
    %c224 = arith.constant 224 : index
    %c0_42 = arith.constant 0 : index
    %96 = vector.load %arg5[%c224, %c0_42] : memref<992x128xbf16, #tpu.memory_space<vmem>>, vector<32x128xbf16>
    %c10 = arith.constant 10 : index
    %c0_43 = arith.constant 0 : index
    %97 = vector.load %arg2[%c10, %c0_43] : memref<34x128xbf16, #tpu.memory_space<vmem>>, vector<1x128xbf16>
    %98 = arith.extf %97 : vector<1x128xbf16> to vector<1x128xf32>
    %99 = vector.extract_strided_slice %95 {offsets = [0, 0], sizes = [8, 32], strides = [1, 1]} : vector<8x128xf32> to vector<8x32xf32>
    %100 = arith.truncf %99 : vector<8x32xf32> to vector<8x32xbf16>
    %cst_44 = arith.constant dense<0.000000e+00> : vector<8x128xf32>
    %101 = tpu.matmul %100, %96, %cst_44 {dimension_numbers = #tpu.dot_dimension_numbers<[1], [0], [0], [1], [0, 0, 1, 1], [], []>} : vector<8x32xbf16>, vector<32x128xbf16>, vector<8x128xf32> -> vector<8x128xf32>
    %102 = vector.broadcast %98 : vector<1x128xf32> to vector<8x128xf32>
    %103 = arith.addf %101, %102 : vector<8x128xf32>
    %cst_45 = arith.constant 0.000000e+00 : f32
    %104 = vector.broadcast %cst_45 : f32 to vector<8x128xf32>
    %105 = arith.maximumf %103, %104 : vector<8x128xf32>
    %c256 = arith.constant 256 : index
    %c0_46 = arith.constant 0 : index
    %106 = vector.load %arg5[%c256, %c0_46] : memref<992x128xbf16, #tpu.memory_space<vmem>>, vector<32x128xbf16>
    %c11 = arith.constant 11 : index
    %c0_47 = arith.constant 0 : index
    %107 = vector.load %arg2[%c11, %c0_47] : memref<34x128xbf16, #tpu.memory_space<vmem>>, vector<1x128xbf16>
    %108 = arith.extf %107 : vector<1x128xbf16> to vector<1x128xf32>
    %109 = vector.extract_strided_slice %105 {offsets = [0, 0], sizes = [8, 32], strides = [1, 1]} : vector<8x128xf32> to vector<8x32xf32>
    %110 = arith.truncf %109 : vector<8x32xf32> to vector<8x32xbf16>
    %cst_48 = arith.constant dense<0.000000e+00> : vector<8x128xf32>
    %111 = tpu.matmul %110, %106, %cst_48 {dimension_numbers = #tpu.dot_dimension_numbers<[1], [0], [0], [1], [0, 0, 1, 1], [], []>} : vector<8x32xbf16>, vector<32x128xbf16>, vector<8x128xf32> -> vector<8x128xf32>
    %112 = vector.broadcast %108 : vector<1x128xf32> to vector<8x128xf32>
    %113 = arith.addf %111, %112 : vector<8x128xf32>
    %cst_49 = arith.constant 0.000000e+00 : f32
    %114 = vector.broadcast %cst_49 : f32 to vector<8x128xf32>
    %115 = arith.maximumf %113, %114 : vector<8x128xf32>
    %c288 = arith.constant 288 : index
    %c0_50 = arith.constant 0 : index
    %116 = vector.load %arg5[%c288, %c0_50] : memref<992x128xbf16, #tpu.memory_space<vmem>>, vector<32x128xbf16>
    %c12 = arith.constant 12 : index
    %c0_51 = arith.constant 0 : index
    %117 = vector.load %arg2[%c12, %c0_51] : memref<34x128xbf16, #tpu.memory_space<vmem>>, vector<1x128xbf16>
    %118 = arith.extf %117 : vector<1x128xbf16> to vector<1x128xf32>
    %119 = vector.extract_strided_slice %115 {offsets = [0, 0], sizes = [8, 32], strides = [1, 1]} : vector<8x128xf32> to vector<8x32xf32>
    %120 = arith.truncf %119 : vector<8x32xf32> to vector<8x32xbf16>
    %cst_52 = arith.constant dense<0.000000e+00> : vector<8x128xf32>
    %121 = tpu.matmul %120, %116, %cst_52 {dimension_numbers = #tpu.dot_dimension_numbers<[1], [0], [0], [1], [0, 0, 1, 1], [], []>} : vector<8x32xbf16>, vector<32x128xbf16>, vector<8x128xf32> -> vector<8x128xf32>
    %122 = vector.broadcast %118 : vector<1x128xf32> to vector<8x128xf32>
    %123 = arith.addf %121, %122 : vector<8x128xf32>
    %cst_53 = arith.constant 0.000000e+00 : f32
    %124 = vector.broadcast %cst_53 : f32 to vector<8x128xf32>
    %125 = arith.maximumf %123, %124 : vector<8x128xf32>
    %c320 = arith.constant 320 : index
    %c0_54 = arith.constant 0 : index
    %126 = vector.load %arg5[%c320, %c0_54] : memref<992x128xbf16, #tpu.memory_space<vmem>>, vector<32x128xbf16>
    %c13 = arith.constant 13 : index
    %c0_55 = arith.constant 0 : index
    %127 = vector.load %arg2[%c13, %c0_55] : memref<34x128xbf16, #tpu.memory_space<vmem>>, vector<1x128xbf16>
    %128 = arith.extf %127 : vector<1x128xbf16> to vector<1x128xf32>
    %129 = vector.extract_strided_slice %125 {offsets = [0, 0], sizes = [8, 32], strides = [1, 1]} : vector<8x128xf32> to vector<8x32xf32>
    %130 = arith.truncf %129 : vector<8x32xf32> to vector<8x32xbf16>
    %cst_56 = arith.constant dense<0.000000e+00> : vector<8x128xf32>
    %131 = tpu.matmul %130, %126, %cst_56 {dimension_numbers = #tpu.dot_dimension_numbers<[1], [0], [0], [1], [0, 0, 1, 1], [], []>} : vector<8x32xbf16>, vector<32x128xbf16>, vector<8x128xf32> -> vector<8x128xf32>
    %132 = vector.broadcast %128 : vector<1x128xf32> to vector<8x128xf32>
    %133 = arith.addf %131, %132 : vector<8x128xf32>
    %cst_57 = arith.constant 0.000000e+00 : f32
    %134 = vector.broadcast %cst_57 : f32 to vector<8x128xf32>
    %135 = arith.maximumf %133, %134 : vector<8x128xf32>
    %c352 = arith.constant 352 : index
    %c0_58 = arith.constant 0 : index
    %136 = vector.load %arg5[%c352, %c0_58] : memref<992x128xbf16, #tpu.memory_space<vmem>>, vector<32x128xbf16>
    %c14 = arith.constant 14 : index
    %c0_59 = arith.constant 0 : index
    %137 = vector.load %arg2[%c14, %c0_59] : memref<34x128xbf16, #tpu.memory_space<vmem>>, vector<1x128xbf16>
    %138 = arith.extf %137 : vector<1x128xbf16> to vector<1x128xf32>
    %139 = vector.extract_strided_slice %135 {offsets = [0, 0], sizes = [8, 32], strides = [1, 1]} : vector<8x128xf32> to vector<8x32xf32>
    %140 = arith.truncf %139 : vector<8x32xf32> to vector<8x32xbf16>
    %cst_60 = arith.constant dense<0.000000e+00> : vector<8x128xf32>
    %141 = tpu.matmul %140, %136, %cst_60 {dimension_numbers = #tpu.dot_dimension_numbers<[1], [0], [0], [1], [0, 0, 1, 1], [], []>} : vector<8x32xbf16>, vector<32x128xbf16>, vector<8x128xf32> -> vector<8x128xf32>
    %142 = vector.broadcast %138 : vector<1x128xf32> to vector<8x128xf32>
    %143 = arith.addf %141, %142 : vector<8x128xf32>
    %cst_61 = arith.constant 0.000000e+00 : f32
    %144 = vector.broadcast %cst_61 : f32 to vector<8x128xf32>
    %145 = arith.maximumf %143, %144 : vector<8x128xf32>
    %c384 = arith.constant 384 : index
    %c0_62 = arith.constant 0 : index
    %146 = vector.load %arg5[%c384, %c0_62] : memref<992x128xbf16, #tpu.memory_space<vmem>>, vector<32x128xbf16>
    %c15 = arith.constant 15 : index
    %c0_63 = arith.constant 0 : index
    %147 = vector.load %arg2[%c15, %c0_63] : memref<34x128xbf16, #tpu.memory_space<vmem>>, vector<1x128xbf16>
    %148 = arith.extf %147 : vector<1x128xbf16> to vector<1x128xf32>
    %149 = vector.extract_strided_slice %145 {offsets = [0, 0], sizes = [8, 32], strides = [1, 1]} : vector<8x128xf32> to vector<8x32xf32>
    %150 = arith.truncf %149 : vector<8x32xf32> to vector<8x32xbf16>
    %cst_64 = arith.constant dense<0.000000e+00> : vector<8x128xf32>
    %151 = tpu.matmul %150, %146, %cst_64 {dimension_numbers = #tpu.dot_dimension_numbers<[1], [0], [0], [1], [0, 0, 1, 1], [], []>} : vector<8x32xbf16>, vector<32x128xbf16>, vector<8x128xf32> -> vector<8x128xf32>
    %152 = vector.broadcast %148 : vector<1x128xf32> to vector<8x128xf32>
    %153 = arith.addf %151, %152 : vector<8x128xf32>
    %cst_65 = arith.constant 0.000000e+00 : f32
    %154 = vector.broadcast %cst_65 : f32 to vector<8x128xf32>
    %155 = arith.maximumf %153, %154 : vector<8x128xf32>
    %c416 = arith.constant 416 : index
    %c0_66 = arith.constant 0 : index
    %156 = vector.load %arg5[%c416, %c0_66] : memref<992x128xbf16, #tpu.memory_space<vmem>>, vector<32x128xbf16>
    %c16 = arith.constant 16 : index
    %c0_67 = arith.constant 0 : index
    %157 = vector.load %arg2[%c16, %c0_67] : memref<34x128xbf16, #tpu.memory_space<vmem>>, vector<1x128xbf16>
    %158 = arith.extf %157 : vector<1x128xbf16> to vector<1x128xf32>
    %159 = vector.extract_strided_slice %155 {offsets = [0, 0], sizes = [8, 32], strides = [1, 1]} : vector<8x128xf32> to vector<8x32xf32>
    %160 = arith.truncf %159 : vector<8x32xf32> to vector<8x32xbf16>
    %cst_68 = arith.constant dense<0.000000e+00> : vector<8x128xf32>
    %161 = tpu.matmul %160, %156, %cst_68 {dimension_numbers = #tpu.dot_dimension_numbers<[1], [0], [0], [1], [0, 0, 1, 1], [], []>} : vector<8x32xbf16>, vector<32x128xbf16>, vector<8x128xf32> -> vector<8x128xf32>
    %162 = vector.broadcast %158 : vector<1x128xf32> to vector<8x128xf32>
    %163 = arith.addf %161, %162 : vector<8x128xf32>
    %cst_69 = arith.constant 0.000000e+00 : f32
    %164 = vector.broadcast %cst_69 : f32 to vector<8x128xf32>
    %165 = arith.maximumf %163, %164 : vector<8x128xf32>
    %c448 = arith.constant 448 : index
    %c0_70 = arith.constant 0 : index
    %166 = vector.load %arg5[%c448, %c0_70] : memref<992x128xbf16, #tpu.memory_space<vmem>>, vector<32x128xbf16>
    %c17 = arith.constant 17 : index
    %c0_71 = arith.constant 0 : index
    %167 = vector.load %arg2[%c17, %c0_71] : memref<34x128xbf16, #tpu.memory_space<vmem>>, vector<1x128xbf16>
    %168 = arith.extf %167 : vector<1x128xbf16> to vector<1x128xf32>
    %169 = vector.extract_strided_slice %165 {offsets = [0, 0], sizes = [8, 32], strides = [1, 1]} : vector<8x128xf32> to vector<8x32xf32>
    %170 = arith.truncf %169 : vector<8x32xf32> to vector<8x32xbf16>
    %cst_72 = arith.constant dense<0.000000e+00> : vector<8x128xf32>
    %171 = tpu.matmul %170, %166, %cst_72 {dimension_numbers = #tpu.dot_dimension_numbers<[1], [0], [0], [1], [0, 0, 1, 1], [], []>} : vector<8x32xbf16>, vector<32x128xbf16>, vector<8x128xf32> -> vector<8x128xf32>
    %172 = vector.broadcast %168 : vector<1x128xf32> to vector<8x128xf32>
    %173 = arith.addf %171, %172 : vector<8x128xf32>
    %cst_73 = arith.constant 0.000000e+00 : f32
    %174 = vector.broadcast %cst_73 : f32 to vector<8x128xf32>
    %175 = arith.maximumf %173, %174 : vector<8x128xf32>
    %c480 = arith.constant 480 : index
    %c0_74 = arith.constant 0 : index
    %176 = vector.load %arg5[%c480, %c0_74] : memref<992x128xbf16, #tpu.memory_space<vmem>>, vector<32x128xbf16>
    %c18 = arith.constant 18 : index
    %c0_75 = arith.constant 0 : index
    %177 = vector.load %arg2[%c18, %c0_75] : memref<34x128xbf16, #tpu.memory_space<vmem>>, vector<1x128xbf16>
    %178 = arith.extf %177 : vector<1x128xbf16> to vector<1x128xf32>
    %179 = vector.extract_strided_slice %175 {offsets = [0, 0], sizes = [8, 32], strides = [1, 1]} : vector<8x128xf32> to vector<8x32xf32>
    %180 = arith.truncf %179 : vector<8x32xf32> to vector<8x32xbf16>
    %cst_76 = arith.constant dense<0.000000e+00> : vector<8x128xf32>
    %181 = tpu.matmul %180, %176, %cst_76 {dimension_numbers = #tpu.dot_dimension_numbers<[1], [0], [0], [1], [0, 0, 1, 1], [], []>} : vector<8x32xbf16>, vector<32x128xbf16>, vector<8x128xf32> -> vector<8x128xf32>
    %182 = vector.broadcast %178 : vector<1x128xf32> to vector<8x128xf32>
    %183 = arith.addf %181, %182 : vector<8x128xf32>
    %cst_77 = arith.constant 0.000000e+00 : f32
    %184 = vector.broadcast %cst_77 : f32 to vector<8x128xf32>
    %185 = arith.maximumf %183, %184 : vector<8x128xf32>
    %c512 = arith.constant 512 : index
    %c0_78 = arith.constant 0 : index
    %186 = vector.load %arg5[%c512, %c0_78] : memref<992x128xbf16, #tpu.memory_space<vmem>>, vector<32x128xbf16>
    %c19 = arith.constant 19 : index
    %c0_79 = arith.constant 0 : index
    %187 = vector.load %arg2[%c19, %c0_79] : memref<34x128xbf16, #tpu.memory_space<vmem>>, vector<1x128xbf16>
    %188 = arith.extf %187 : vector<1x128xbf16> to vector<1x128xf32>
    %189 = vector.extract_strided_slice %185 {offsets = [0, 0], sizes = [8, 32], strides = [1, 1]} : vector<8x128xf32> to vector<8x32xf32>
    %190 = arith.truncf %189 : vector<8x32xf32> to vector<8x32xbf16>
    %cst_80 = arith.constant dense<0.000000e+00> : vector<8x128xf32>
    %191 = tpu.matmul %190, %186, %cst_80 {dimension_numbers = #tpu.dot_dimension_numbers<[1], [0], [0], [1], [0, 0, 1, 1], [], []>} : vector<8x32xbf16>, vector<32x128xbf16>, vector<8x128xf32> -> vector<8x128xf32>
    %192 = vector.broadcast %188 : vector<1x128xf32> to vector<8x128xf32>
    %193 = arith.addf %191, %192 : vector<8x128xf32>
    %cst_81 = arith.constant 0.000000e+00 : f32
    %194 = vector.broadcast %cst_81 : f32 to vector<8x128xf32>
    %195 = arith.maximumf %193, %194 : vector<8x128xf32>
    %c544 = arith.constant 544 : index
    %c0_82 = arith.constant 0 : index
    %196 = vector.load %arg5[%c544, %c0_82] : memref<992x128xbf16, #tpu.memory_space<vmem>>, vector<32x128xbf16>
    %c20 = arith.constant 20 : index
    %c0_83 = arith.constant 0 : index
    %197 = vector.load %arg2[%c20, %c0_83] : memref<34x128xbf16, #tpu.memory_space<vmem>>, vector<1x128xbf16>
    %198 = arith.extf %197 : vector<1x128xbf16> to vector<1x128xf32>
    %199 = vector.extract_strided_slice %195 {offsets = [0, 0], sizes = [8, 32], strides = [1, 1]} : vector<8x128xf32> to vector<8x32xf32>
    %200 = arith.truncf %199 : vector<8x32xf32> to vector<8x32xbf16>
    %cst_84 = arith.constant dense<0.000000e+00> : vector<8x128xf32>
    %201 = tpu.matmul %200, %196, %cst_84 {dimension_numbers = #tpu.dot_dimension_numbers<[1], [0], [0], [1], [0, 0, 1, 1], [], []>} : vector<8x32xbf16>, vector<32x128xbf16>, vector<8x128xf32> -> vector<8x128xf32>
    %202 = vector.broadcast %198 : vector<1x128xf32> to vector<8x128xf32>
    %203 = arith.addf %201, %202 : vector<8x128xf32>
    %cst_85 = arith.constant 0.000000e+00 : f32
    %204 = vector.broadcast %cst_85 : f32 to vector<8x128xf32>
    %205 = arith.maximumf %203, %204 : vector<8x128xf32>
    %c576 = arith.constant 576 : index
    %c0_86 = arith.constant 0 : index
    %206 = vector.load %arg5[%c576, %c0_86] : memref<992x128xbf16, #tpu.memory_space<vmem>>, vector<32x128xbf16>
    %c21 = arith.constant 21 : index
    %c0_87 = arith.constant 0 : index
    %207 = vector.load %arg2[%c21, %c0_87] : memref<34x128xbf16, #tpu.memory_space<vmem>>, vector<1x128xbf16>
    %208 = arith.extf %207 : vector<1x128xbf16> to vector<1x128xf32>
    %209 = vector.extract_strided_slice %205 {offsets = [0, 0], sizes = [8, 32], strides = [1, 1]} : vector<8x128xf32> to vector<8x32xf32>
    %210 = arith.truncf %209 : vector<8x32xf32> to vector<8x32xbf16>
    %cst_88 = arith.constant dense<0.000000e+00> : vector<8x128xf32>
    %211 = tpu.matmul %210, %206, %cst_88 {dimension_numbers = #tpu.dot_dimension_numbers<[1], [0], [0], [1], [0, 0, 1, 1], [], []>} : vector<8x32xbf16>, vector<32x128xbf16>, vector<8x128xf32> -> vector<8x128xf32>
    %212 = vector.broadcast %208 : vector<1x128xf32> to vector<8x128xf32>
    %213 = arith.addf %211, %212 : vector<8x128xf32>
    %cst_89 = arith.constant 0.000000e+00 : f32
    %214 = vector.broadcast %cst_89 : f32 to vector<8x128xf32>
    %215 = arith.maximumf %213, %214 : vector<8x128xf32>
    %c608 = arith.constant 608 : index
    %c0_90 = arith.constant 0 : index
    %216 = vector.load %arg5[%c608, %c0_90] : memref<992x128xbf16, #tpu.memory_space<vmem>>, vector<32x128xbf16>
    %c22 = arith.constant 22 : index
    %c0_91 = arith.constant 0 : index
    %217 = vector.load %arg2[%c22, %c0_91] : memref<34x128xbf16, #tpu.memory_space<vmem>>, vector<1x128xbf16>
    %218 = arith.extf %217 : vector<1x128xbf16> to vector<1x128xf32>
    %219 = vector.extract_strided_slice %215 {offsets = [0, 0], sizes = [8, 32], strides = [1, 1]} : vector<8x128xf32> to vector<8x32xf32>
    %220 = arith.truncf %219 : vector<8x32xf32> to vector<8x32xbf16>
    %cst_92 = arith.constant dense<0.000000e+00> : vector<8x128xf32>
    %221 = tpu.matmul %220, %216, %cst_92 {dimension_numbers = #tpu.dot_dimension_numbers<[1], [0], [0], [1], [0, 0, 1, 1], [], []>} : vector<8x32xbf16>, vector<32x128xbf16>, vector<8x128xf32> -> vector<8x128xf32>
    %222 = vector.broadcast %218 : vector<1x128xf32> to vector<8x128xf32>
    %223 = arith.addf %221, %222 : vector<8x128xf32>
    %cst_93 = arith.constant 0.000000e+00 : f32
    %224 = vector.broadcast %cst_93 : f32 to vector<8x128xf32>
    %225 = arith.maximumf %223, %224 : vector<8x128xf32>
    %c640 = arith.constant 640 : index
    %c0_94 = arith.constant 0 : index
    %226 = vector.load %arg5[%c640, %c0_94] : memref<992x128xbf16, #tpu.memory_space<vmem>>, vector<32x128xbf16>
    %c23 = arith.constant 23 : index
    %c0_95 = arith.constant 0 : index
    %227 = vector.load %arg2[%c23, %c0_95] : memref<34x128xbf16, #tpu.memory_space<vmem>>, vector<1x128xbf16>
    %228 = arith.extf %227 : vector<1x128xbf16> to vector<1x128xf32>
    %229 = vector.extract_strided_slice %225 {offsets = [0, 0], sizes = [8, 32], strides = [1, 1]} : vector<8x128xf32> to vector<8x32xf32>
    %230 = arith.truncf %229 : vector<8x32xf32> to vector<8x32xbf16>
    %cst_96 = arith.constant dense<0.000000e+00> : vector<8x128xf32>
    %231 = tpu.matmul %230, %226, %cst_96 {dimension_numbers = #tpu.dot_dimension_numbers<[1], [0], [0], [1], [0, 0, 1, 1], [], []>} : vector<8x32xbf16>, vector<32x128xbf16>, vector<8x128xf32> -> vector<8x128xf32>
    %232 = vector.broadcast %228 : vector<1x128xf32> to vector<8x128xf32>
    %233 = arith.addf %231, %232 : vector<8x128xf32>
    %cst_97 = arith.constant 0.000000e+00 : f32
    %234 = vector.broadcast %cst_97 : f32 to vector<8x128xf32>
    %235 = arith.maximumf %233, %234 : vector<8x128xf32>
    %c672 = arith.constant 672 : index
    %c0_98 = arith.constant 0 : index
    %236 = vector.load %arg5[%c672, %c0_98] : memref<992x128xbf16, #tpu.memory_space<vmem>>, vector<32x128xbf16>
    %c24 = arith.constant 24 : index
    %c0_99 = arith.constant 0 : index
    %237 = vector.load %arg2[%c24, %c0_99] : memref<34x128xbf16, #tpu.memory_space<vmem>>, vector<1x128xbf16>
    %238 = arith.extf %237 : vector<1x128xbf16> to vector<1x128xf32>
    %239 = vector.extract_strided_slice %235 {offsets = [0, 0], sizes = [8, 32], strides = [1, 1]} : vector<8x128xf32> to vector<8x32xf32>
    %240 = arith.truncf %239 : vector<8x32xf32> to vector<8x32xbf16>
    %cst_100 = arith.constant dense<0.000000e+00> : vector<8x128xf32>
    %241 = tpu.matmul %240, %236, %cst_100 {dimension_numbers = #tpu.dot_dimension_numbers<[1], [0], [0], [1], [0, 0, 1, 1], [], []>} : vector<8x32xbf16>, vector<32x128xbf16>, vector<8x128xf32> -> vector<8x128xf32>
    %242 = vector.broadcast %238 : vector<1x128xf32> to vector<8x128xf32>
    %243 = arith.addf %241, %242 : vector<8x128xf32>
    %cst_101 = arith.constant 0.000000e+00 : f32
    %244 = vector.broadcast %cst_101 : f32 to vector<8x128xf32>
    %245 = arith.maximumf %243, %244 : vector<8x128xf32>
    %c704 = arith.constant 704 : index
    %c0_102 = arith.constant 0 : index
    %246 = vector.load %arg5[%c704, %c0_102] : memref<992x128xbf16, #tpu.memory_space<vmem>>, vector<32x128xbf16>
    %c25 = arith.constant 25 : index
    %c0_103 = arith.constant 0 : index
    %247 = vector.load %arg2[%c25, %c0_103] : memref<34x128xbf16, #tpu.memory_space<vmem>>, vector<1x128xbf16>
    %248 = arith.extf %247 : vector<1x128xbf16> to vector<1x128xf32>
    %249 = vector.extract_strided_slice %245 {offsets = [0, 0], sizes = [8, 32], strides = [1, 1]} : vector<8x128xf32> to vector<8x32xf32>
    %250 = arith.truncf %249 : vector<8x32xf32> to vector<8x32xbf16>
    %cst_104 = arith.constant dense<0.000000e+00> : vector<8x128xf32>
    %251 = tpu.matmul %250, %246, %cst_104 {dimension_numbers = #tpu.dot_dimension_numbers<[1], [0], [0], [1], [0, 0, 1, 1], [], []>} : vector<8x32xbf16>, vector<32x128xbf16>, vector<8x128xf32> -> vector<8x128xf32>
    %252 = vector.broadcast %248 : vector<1x128xf32> to vector<8x128xf32>
    %253 = arith.addf %251, %252 : vector<8x128xf32>
    %cst_105 = arith.constant 0.000000e+00 : f32
    %254 = vector.broadcast %cst_105 : f32 to vector<8x128xf32>
    %255 = arith.maximumf %253, %254 : vector<8x128xf32>
    %c736 = arith.constant 736 : index
    %c0_106 = arith.constant 0 : index
    %256 = vector.load %arg5[%c736, %c0_106] : memref<992x128xbf16, #tpu.memory_space<vmem>>, vector<32x128xbf16>
    %c26 = arith.constant 26 : index
    %c0_107 = arith.constant 0 : index
    %257 = vector.load %arg2[%c26, %c0_107] : memref<34x128xbf16, #tpu.memory_space<vmem>>, vector<1x128xbf16>
    %258 = arith.extf %257 : vector<1x128xbf16> to vector<1x128xf32>
    %259 = vector.extract_strided_slice %255 {offsets = [0, 0], sizes = [8, 32], strides = [1, 1]} : vector<8x128xf32> to vector<8x32xf32>
    %260 = arith.truncf %259 : vector<8x32xf32> to vector<8x32xbf16>
    %cst_108 = arith.constant dense<0.000000e+00> : vector<8x128xf32>
    %261 = tpu.matmul %260, %256, %cst_108 {dimension_numbers = #tpu.dot_dimension_numbers<[1], [0], [0], [1], [0, 0, 1, 1], [], []>} : vector<8x32xbf16>, vector<32x128xbf16>, vector<8x128xf32> -> vector<8x128xf32>
    %262 = vector.broadcast %258 : vector<1x128xf32> to vector<8x128xf32>
    %263 = arith.addf %261, %262 : vector<8x128xf32>
    %cst_109 = arith.constant 0.000000e+00 : f32
    %264 = vector.broadcast %cst_109 : f32 to vector<8x128xf32>
    %265 = arith.maximumf %263, %264 : vector<8x128xf32>
    %c768 = arith.constant 768 : index
    %c0_110 = arith.constant 0 : index
    %266 = vector.load %arg5[%c768, %c0_110] : memref<992x128xbf16, #tpu.memory_space<vmem>>, vector<32x128xbf16>
    %c27 = arith.constant 27 : index
    %c0_111 = arith.constant 0 : index
    %267 = vector.load %arg2[%c27, %c0_111] : memref<34x128xbf16, #tpu.memory_space<vmem>>, vector<1x128xbf16>
    %268 = arith.extf %267 : vector<1x128xbf16> to vector<1x128xf32>
    %269 = vector.extract_strided_slice %265 {offsets = [0, 0], sizes = [8, 32], strides = [1, 1]} : vector<8x128xf32> to vector<8x32xf32>
    %270 = arith.truncf %269 : vector<8x32xf32> to vector<8x32xbf16>
    %cst_112 = arith.constant dense<0.000000e+00> : vector<8x128xf32>
    %271 = tpu.matmul %270, %266, %cst_112 {dimension_numbers = #tpu.dot_dimension_numbers<[1], [0], [0], [1], [0, 0, 1, 1], [], []>} : vector<8x32xbf16>, vector<32x128xbf16>, vector<8x128xf32> -> vector<8x128xf32>
    %272 = vector.broadcast %268 : vector<1x128xf32> to vector<8x128xf32>
    %273 = arith.addf %271, %272 : vector<8x128xf32>
    %cst_113 = arith.constant 0.000000e+00 : f32
    %274 = vector.broadcast %cst_113 : f32 to vector<8x128xf32>
    %275 = arith.maximumf %273, %274 : vector<8x128xf32>
    %c800 = arith.constant 800 : index
    %c0_114 = arith.constant 0 : index
    %276 = vector.load %arg5[%c800, %c0_114] : memref<992x128xbf16, #tpu.memory_space<vmem>>, vector<32x128xbf16>
    %c28 = arith.constant 28 : index
    %c0_115 = arith.constant 0 : index
    %277 = vector.load %arg2[%c28, %c0_115] : memref<34x128xbf16, #tpu.memory_space<vmem>>, vector<1x128xbf16>
    %278 = arith.extf %277 : vector<1x128xbf16> to vector<1x128xf32>
    %279 = vector.extract_strided_slice %275 {offsets = [0, 0], sizes = [8, 32], strides = [1, 1]} : vector<8x128xf32> to vector<8x32xf32>
    %280 = arith.truncf %279 : vector<8x32xf32> to vector<8x32xbf16>
    %cst_116 = arith.constant dense<0.000000e+00> : vector<8x128xf32>
    %281 = tpu.matmul %280, %276, %cst_116 {dimension_numbers = #tpu.dot_dimension_numbers<[1], [0], [0], [1], [0, 0, 1, 1], [], []>} : vector<8x32xbf16>, vector<32x128xbf16>, vector<8x128xf32> -> vector<8x128xf32>
    %282 = vector.broadcast %278 : vector<1x128xf32> to vector<8x128xf32>
    %283 = arith.addf %281, %282 : vector<8x128xf32>
    %cst_117 = arith.constant 0.000000e+00 : f32
    %284 = vector.broadcast %cst_117 : f32 to vector<8x128xf32>
    %285 = arith.maximumf %283, %284 : vector<8x128xf32>
    %c832 = arith.constant 832 : index
    %c0_118 = arith.constant 0 : index
    %286 = vector.load %arg5[%c832, %c0_118] : memref<992x128xbf16, #tpu.memory_space<vmem>>, vector<32x128xbf16>
    %c29 = arith.constant 29 : index
    %c0_119 = arith.constant 0 : index
    %287 = vector.load %arg2[%c29, %c0_119] : memref<34x128xbf16, #tpu.memory_space<vmem>>, vector<1x128xbf16>
    %288 = arith.extf %287 : vector<1x128xbf16> to vector<1x128xf32>
    %289 = vector.extract_strided_slice %285 {offsets = [0, 0], sizes = [8, 32], strides = [1, 1]} : vector<8x128xf32> to vector<8x32xf32>
    %290 = arith.truncf %289 : vector<8x32xf32> to vector<8x32xbf16>
    %cst_120 = arith.constant dense<0.000000e+00> : vector<8x128xf32>
    %291 = tpu.matmul %290, %286, %cst_120 {dimension_numbers = #tpu.dot_dimension_numbers<[1], [0], [0], [1], [0, 0, 1, 1], [], []>} : vector<8x32xbf16>, vector<32x128xbf16>, vector<8x128xf32> -> vector<8x128xf32>
    %292 = vector.broadcast %288 : vector<1x128xf32> to vector<8x128xf32>
    %293 = arith.addf %291, %292 : vector<8x128xf32>
    %cst_121 = arith.constant 0.000000e+00 : f32
    %294 = vector.broadcast %cst_121 : f32 to vector<8x128xf32>
    %295 = arith.maximumf %293, %294 : vector<8x128xf32>
    %c864 = arith.constant 864 : index
    %c0_122 = arith.constant 0 : index
    %296 = vector.load %arg5[%c864, %c0_122] : memref<992x128xbf16, #tpu.memory_space<vmem>>, vector<32x128xbf16>
    %c30 = arith.constant 30 : index
    %c0_123 = arith.constant 0 : index
    %297 = vector.load %arg2[%c30, %c0_123] : memref<34x128xbf16, #tpu.memory_space<vmem>>, vector<1x128xbf16>
    %298 = arith.extf %297 : vector<1x128xbf16> to vector<1x128xf32>
    %299 = vector.extract_strided_slice %295 {offsets = [0, 0], sizes = [8, 32], strides = [1, 1]} : vector<8x128xf32> to vector<8x32xf32>
    %300 = arith.truncf %299 : vector<8x32xf32> to vector<8x32xbf16>
    %cst_124 = arith.constant dense<0.000000e+00> : vector<8x128xf32>
    %301 = tpu.matmul %300, %296, %cst_124 {dimension_numbers = #tpu.dot_dimension_numbers<[1], [0], [0], [1], [0, 0, 1, 1], [], []>} : vector<8x32xbf16>, vector<32x128xbf16>, vector<8x128xf32> -> vector<8x128xf32>
    %302 = vector.broadcast %298 : vector<1x128xf32> to vector<8x128xf32>
    %303 = arith.addf %301, %302 : vector<8x128xf32>
    %cst_125 = arith.constant 0.000000e+00 : f32
    %304 = vector.broadcast %cst_125 : f32 to vector<8x128xf32>
    %305 = arith.maximumf %303, %304 : vector<8x128xf32>
    %c896_126 = arith.constant 896 : index
    %c0_127 = arith.constant 0 : index
    %306 = vector.load %arg5[%c896_126, %c0_127] : memref<992x128xbf16, #tpu.memory_space<vmem>>, vector<32x128xbf16>
    %c31 = arith.constant 31 : index
    %c0_128 = arith.constant 0 : index
    %307 = vector.load %arg2[%c31, %c0_128] : memref<34x128xbf16, #tpu.memory_space<vmem>>, vector<1x128xbf16>
    %308 = arith.extf %307 : vector<1x128xbf16> to vector<1x128xf32>
    %309 = vector.extract_strided_slice %305 {offsets = [0, 0], sizes = [8, 32], strides = [1, 1]} : vector<8x128xf32> to vector<8x32xf32>
    %310 = arith.truncf %309 : vector<8x32xf32> to vector<8x32xbf16>
    %cst_129 = arith.constant dense<0.000000e+00> : vector<8x128xf32>
    %311 = tpu.matmul %310, %306, %cst_129 {dimension_numbers = #tpu.dot_dimension_numbers<[1], [0], [0], [1], [0, 0, 1, 1], [], []>} : vector<8x32xbf16>, vector<32x128xbf16>, vector<8x128xf32> -> vector<8x128xf32>
    %312 = vector.broadcast %308 : vector<1x128xf32> to vector<8x128xf32>
    %313 = arith.addf %311, %312 : vector<8x128xf32>
    %cst_130 = arith.constant 0.000000e+00 : f32
    %314 = vector.broadcast %cst_130 : f32 to vector<8x128xf32>
    %315 = arith.maximumf %313, %314 : vector<8x128xf32>
    %c928 = arith.constant 928 : index
    %c0_131 = arith.constant 0 : index
    %316 = vector.load %arg5[%c928, %c0_131] : memref<992x128xbf16, #tpu.memory_space<vmem>>, vector<32x128xbf16>
    %c32_132 = arith.constant 32 : index
    %c0_133 = arith.constant 0 : index
    %317 = vector.load %arg2[%c32_132, %c0_133] : memref<34x128xbf16, #tpu.memory_space<vmem>>, vector<1x128xbf16>
    %318 = arith.extf %317 : vector<1x128xbf16> to vector<1x128xf32>
    %319 = vector.extract_strided_slice %315 {offsets = [0, 0], sizes = [8, 32], strides = [1, 1]} : vector<8x128xf32> to vector<8x32xf32>
    %320 = arith.truncf %319 : vector<8x32xf32> to vector<8x32xbf16>
    %cst_134 = arith.constant dense<0.000000e+00> : vector<8x128xf32>
    %321 = tpu.matmul %320, %316, %cst_134 {dimension_numbers = #tpu.dot_dimension_numbers<[1], [0], [0], [1], [0, 0, 1, 1], [], []>} : vector<8x32xbf16>, vector<32x128xbf16>, vector<8x128xf32> -> vector<8x128xf32>
    %322 = vector.broadcast %318 : vector<1x128xf32> to vector<8x128xf32>
    %323 = arith.addf %321, %322 : vector<8x128xf32>
    %cst_135 = arith.constant 0.000000e+00 : f32
    %324 = vector.broadcast %cst_135 : f32 to vector<8x128xf32>
    %325 = arith.maximumf %323, %324 : vector<8x128xf32>
    %c960 = arith.constant 960 : index
    %c0_136 = arith.constant 0 : index
    %326 = vector.load %arg5[%c960, %c0_136] : memref<992x128xbf16, #tpu.memory_space<vmem>>, vector<32x128xbf16>
    %c33 = arith.constant 33 : index
    %c0_137 = arith.constant 0 : index
    %327 = vector.load %arg2[%c33, %c0_137] : memref<34x128xbf16, #tpu.memory_space<vmem>>, vector<1x128xbf16>
    %328 = arith.extf %327 : vector<1x128xbf16> to vector<1x128xf32>
    %329 = vector.extract_strided_slice %325 {offsets = [0, 0], sizes = [8, 32], strides = [1, 1]} : vector<8x128xf32> to vector<8x32xf32>
    %330 = arith.truncf %329 : vector<8x32xf32> to vector<8x32xbf16>
    %cst_138 = arith.constant dense<0.000000e+00> : vector<8x128xf32>
    %331 = tpu.matmul %330, %326, %cst_138 {dimension_numbers = #tpu.dot_dimension_numbers<[1], [0], [0], [1], [0, 0, 1, 1], [], []>} : vector<8x32xbf16>, vector<32x128xbf16>, vector<8x128xf32> -> vector<8x128xf32>
    %332 = vector.broadcast %328 : vector<1x128xf32> to vector<8x128xf32>
    %333 = arith.addf %331, %332 : vector<8x128xf32>
    %c0_139 = arith.constant 0 : index
    %c0_140 = arith.constant 0 : index
    %334 = vector.load %arg4[%c0_139, %c0_140] : memref<8x128xf32, #tpu.memory_space<vmem>>, vector<8x128xf32>
    tpu.vector_store %arg4[%c0_139, %c0_140], %333 {strides = array<i32>} : memref<8x128xf32, #tpu.memory_space<vmem>>, vector<8x128xf32>,
    return
  }
}

</mosaic_0001>

<bundles_post_ra>
// kernel: _forward_jit.1
= control target key start
LH: loop header
LB: loop body
LE: loop exit
PB: predicated region body
PF: predicated region fallthrough
CT: control target
= control target key end

     0   :  { %9 = vsyncpa [#allocation5], 0  ;;  %s2593_s18 = smov [#allocation4]   ;;  %s2594_s20 = smov 64   ;;  %s2737_s0 = inlined_call_operand.vmem [shape: f32[8,896], index: 0, kind: input, shape index: {}]   ;;  %s2738_s1 = inlined_call_operand.hbm [shape: bf16[1088,128], index: 1, kind: input, shape index: {}]   ;;  %s2739_s2 = inlined_call_operand.vmem [shape: bf16[34,128], index: 2, kind: input, shape index: {}]   ;;  %s2740_s3 = inlined_call_operand.hbm [shape: bf16[992,128], index: 3, kind: input, shape index: {}]   ;;  %s2741_s4 = inlined_call_operand.vmem [shape: f32[8,128], index: 4, kind: output, shape index: {}]  }
   0x1   :  { %s16_s17 = sshll.u32 %s2738_s1, 4  ;;  %s18_s19 = sshll.u32 %s2593_s18, 4  ;;  %s17_s17 = int_to_ptr.hbm [resolvable:$true] %s16_s17  ;;  %s19_s19 = int_to_ptr.vmem [resolvable:$true] %s18_s19 }
   0x2   :  { %s2595_s21 = smov 4  }
   0x3   :  { %24 = dma.hbm_to_vmem [thread:$0]  %s17_s17, 8704, %s19_s19, [#allocation5], %s2594_s20, %s2594_s20, %s2595_s21  }
   0x4   :  { %2589 = dma.done.wait [#allocation5], 8704  }
   0x5   :  { %2590 = vsyncadd [#allocation5], 4294958592  ;;  %v2430_v0 = vld [vmem:[#allocation4 + $0xb8] sm:$0xff]  ;;  %v2429_v3 = vld [vmem:[#allocation4 + $0xb0] sm:$0xff]  ;;  %vm704_vm0 = vcmask 523264   ;;  %s39_s12 = sshll.u32 %s2740_s3, 4  ;;  %s40_s12 = int_to_ptr.hbm [resolvable:$true] %s39_s12 }
   0x6   :  { %v2414_v1 = vld [vmem:[#allocation4 + $0x38] sm:$0xff]  ;;  %527 = vmatpush.bf16.msra.mxu2 %v2430_v0  ;;  %v2413_v4 = vld [vmem:[#allocation4 + $0x30] sm:$0xff]  ;;  %v2428_v7 = vld [vmem:[#allocation4 + $0xa8] sm:$0xff]  ;;  %s2596_s13 = smov [#allocation2]  }
   0x7   :  { %v2422_v2 = vld [vmem:[#allocation4 + $0x78] sm:$0xff]  ;;  %503 = vmatpush.bf16.msra.mxu0 %v2414_v1  ;;  %v2421_v5 = vld [vmem:[#allocation4 + $0x70] sm:$0xff]  ;;  %v2412_v8 = vld [vmem:[#allocation4 + $0x28] sm:$0xff]  ;;  %s41_s14 = sshll.u32 %s2596_s13, 4  ;;  %s42_s14 = int_to_ptr.vmem [resolvable:$true] %s41_s14 }
   0x8   :  { %515 = vmatpush.bf16.msra.mxu1 %v2422_v2  ;;  %v2438_v6 = vld [vmem:[#allocation4 + $0xf8] sm:$0xff]  ;;  %v2420_v9 = vld [vmem:[#allocation4 + $0x68] sm:$0xff]  ;;  %v2437_v10 = vld [vmem:[#allocation4 + $0xf0] sm:$0xff]  ;;  %44 = dma.hbm_to_vmem [thread:$0]  %s40_s12, 7936, %s42_s14, [#allocation3] }
   0x9   :  { %539 = vmatpush.bf16.msra.mxu3 %v2438_v6  ;;  %v2427_v11 = vld [vmem:[#allocation4 + $0xa0] sm:$0xff]  ;;  %v2436_v14 = vld [vmem:[#allocation4 + $0xe8] sm:$0xff]  ;;  %v2426_v15 = vld [vmem:[#allocation4 + $0x98] sm:$0xff] }
   0xa   :  { %528 = vmatpush.bf16.msra.mxu2 %v2429_v3  ;;  %v2411_v12 = vld [vmem:[#allocation4 + $0x20] sm:$0xff]  ;;  %v2410_v16 = vld [vmem:[#allocation4 + $0x18] sm:$0xff]  ;;  %v2425_v19 = vld [vmem:[#allocation4 + $0x90] sm:$0xff] }
   0xb   :  { %504 = vmatpush.bf16.msra.mxu0 %v2413_v4  ;;  %v2419_v13 = vld [vmem:[#allocation4 + $0x60] sm:$0xff]  ;;  %v2418_v17 = vld [vmem:[#allocation4 + $0x58] sm:$0xff]  ;;  %v2409_v20 = vld [vmem:[#allocation4 + $0x10] sm:$0xff] }
   0xc   :  { %516 = vmatpush.bf16.msra.mxu1 %v2421_v5  ;;  %v2435_v18 = vld [vmem:[#allocation4 + $0xe0] sm:$0xff]  ;;  %v2417_v21 = vld [vmem:[#allocation4 + $0x50] sm:$0xff]  ;;  %v2434_v22 = vld [vmem:[#allocation4 + $0xd8] sm:$0xff] }
   0xd   :  { %540 = vmatpush.bf16.msra.mxu3 %v2437_v10  ;;  %v2424_v23 = vld [vmem:[#allocation4 + $0x88] sm:$0xff]  ;;  %v2433_v26 = vld [vmem:[#allocation4 + $0xd0] sm:$0xff]  ;;  %v2423_v27 = vld [vmem:[#allocation4 + $0x80] sm:$0xff] }
   0xe   :  { %529 = vmatpush.bf16.msra.mxu2 %v2428_v7  ;;  %v2408_v24 = vld [vmem:[#allocation4 + $0x8] sm:$0xff]  ;;  %v2407_v28 = vld [vmem:[#allocation4] sm:$0xff]  ;;  %v2462_v29 = vld [vmem:[#allocation4 + $0x1b8] sm:$0xff] }
   0xf   :  { %505 = vmatpush.bf16.msra.mxu0 %v2412_v8  ;;  %v2416_v25 = vld [vmem:[#allocation4 + $0x48] sm:$0xff]  ;;  %v2446_v30 = vld [vmem:[#allocation4 + $0x138] sm:$0xff]  ;;  %v2415_v31 = vld [vmem:[#allocation4 + $0x40] sm:$0xff] }
  0x10   :  { %517 = vmatpush.bf16.msra.mxu1 %v2420_v9  ;;  %v2432_v32 = vld [vmem:[#allocation4 + $0xc8] sm:$0xff]  ;;  %v2454_v33 = vld [vmem:[#allocation4 + $0x178] sm:$0xff]  ;;  %v159_v34 = vld [vmem:[%s2737_s0 + $0x10] sm:$0xff] }
  0x11   :  { %541 = vmatpush.bf16.msra.mxu3 %v2436_v14  ;;  %v2461_v35 = vld [vmem:[#allocation4 + $0x1b0] sm:$0xff]  ;;  %v2431_v38 = vld [vmem:[#allocation4 + $0xc0] sm:$0xff]  ;;  %v158_v40 = vld [vmem:[%s2737_s0 + $0x8] sm:$0xff] }
  0x12   :  { %530 = vmatpush.bf16.msra.mxu2 %v2427_v11  ;;  %v2445_v36 = vld [vmem:[#allocation4 + $0x130] sm:$0xff]  ;;  %v2470_v41 = vld [vmem:[#allocation4 + $0x1f8] sm:$0xff]  ;;  %v2460_v42 = vld [vmem:[#allocation4 + $0x1a8] sm:$0xff] }
  0x13   :  { %506 = vmatpush.bf16.msra.mxu0 %v2411_v12  ;;  %v157_v37 = vld [vmem:[%s2737_s0] sm:$0xff]  ;;  %v2444_v43 = vld [vmem:[#allocation4 + $0x128] sm:$0xff]  ;;  %v2459_v47 = vld [vmem:[#allocation4 + $0x1a0] sm:$0xff] }
  0x14   :  { %518 = vmatpush.bf16.msra.mxu1 %v2419_v13  ;;  %v2453_v39 = vld [vmem:[#allocation4 + $0x170] sm:$0xff]  ;;  %v2452_v44 = vld [vmem:[#allocation4 + $0x168] sm:$0xff]  ;;  %v2443_v48 = vld [vmem:[#allocation4 + $0x120] sm:$0xff] }
  0x15   :  { %542 = vmatpush.bf16.msra.mxu3 %v2435_v18  ;;  %v160_v45 = vld [vmem:[%s2737_s0 + $0x18] sm:$0xff]  ;;  %v2469_v46 = vld [vmem:[#allocation4 + $0x1f0] sm:$0xff]  ;;  %v2451_v49 = vld [vmem:[#allocation4 + $0x160] sm:$0xff] }
  0x16   :  { %531 = vmatpush.bf16.msra.mxu2 %v2426_v15  ;;  %v2468_v50 = vld [vmem:[#allocation4 + $0x1e8] sm:$0xff]  ;;  %v2458_v51 = vld [vmem:[#allocation4 + $0x198] sm:$0xff]  ;;  %v2457_v54 = vld [vmem:[#allocation4 + $0x190] sm:$0xff] }
  0x17   :  { %507 = vmatpush.bf16.msra.mxu0 %v2410_v16  ;;  %v2442_v52 = vld [vmem:[#allocation4 + $0x118] sm:$0xff]  ;;  %v2441_v55 = vld [vmem:[#allocation4 + $0x110] sm:$0xff]  ;;  %v2456_v57 = vld [vmem:[#allocation4 + $0x188] sm:$0xff] }
  0x18   :  { %519 = vmatpush.bf16.msra.mxu1 %v2418_v17  ;;  %v2450_v53 = vld [vmem:[#allocation4 + $0x158] sm:$0xff]  ;;  %v2449_v56 = vld [vmem:[#allocation4 + $0x150] sm:$0xff]  ;;  %v2440_v58 = vld [vmem:[#allocation4 + $0x108] sm:$0xff] }
  0x19   :  { %543 = vmatpush.bf16.msra.mxu3 %v2434_v22  ;;  %v2448_v59 = vld [vmem:[#allocation4 + $0x148] sm:$0xff]  ;;  %v2455_v60 = vld [vmem:[#allocation4 + $0x180] sm:$0xff]  ;;  %v161_v0 = vld [vmem:[%s2737_s0 + $0x20] sm:$0xff] }
  0x1a   :  { %532 = vmatpush.bf16.msra.mxu2 %v2425_v19  ;;  %v2439_v61 = vld [vmem:[#allocation4 + $0x100] sm:$0xff]  ;;  %v162_v1 = vld [vmem:[%s2737_s0 + $0x28] sm:$0xff]  ;;  %v2465_v4 = vld [vmem:[#allocation4 + $0x1d0] sm:$0xff] }
  0x1b   :  { %508 = vmatpush.bf16.msra.mxu0 %v2409_v20  ;;  %v2447_v62 = vld [vmem:[#allocation4 + $0x140] sm:$0xff]  ;;  %v2466_v3 = vld [vmem:[#allocation4 + $0x1d8] sm:$0xff]  ;;  %v2464_v5 = vld [vmem:[#allocation4 + $0x1c8] sm:$0xff] }
  0x1c   :  { %520 = vmatpush.bf16.msra.mxu1 %v2417_v21  ;;  %v163_v63 = vld [vmem:[%s2737_s0 + $0x30] sm:$0xff]  ;;  %v164_v6 = vld [vmem:[%s2739_s2] sm:$0x1]  ;;  %v2474_v10 = vld [vmem:[#allocation4 + $0x218] sm:$0xff] }
  0x1d   :  { %544 = vmatpush.bf16.msra.mxu3 %v2433_v26  ;;  %v2467_v2 = vld [vmem:[#allocation4 + $0x1e0] sm:$0xff]  ;;  %v165_v8 = vunpack.c.l.bf16 %v164_v6  ;;  %v2473_v12 = vld [vmem:[#allocation4 + $0x210] sm:$0xff] }
  0x1e   :  { %533 = vmatpush.bf16.msra.mxu2 %v2424_v23  ;;  %v2463_v7 = vld [vmem:[#allocation4 + $0x1c0] sm:$0xff] }
  0x1f   :  { %509 = vmatpush.bf16.msra.mxu0 %v2408_v24  ;;  %v166_v9 = vperm.slane %v165_v8, 0 }
  0x20   :  { %521 = vmatpush.bf16.msra.mxu1 %v2416_v25 }
  0x21   :  { %545 = vmatpush.bf16.msra.mxu3 %v2432_v32 }
  0x22   :  { %534 = vmatpush.bf16.msra.mxu2 %v2423_v27 }
  0x23   :  { %510 = vmatpush.bf16.msra.mxu0 %v2407_v28  ;;  %v2472_v28 = vld [vmem:[#allocation4 + $0x208] sm:$0xff] }
  0x24   :  { %522 = vmatpush.bf16.msra.mxu1 %v2415_v31 }
  0x25   :  { %535 = vmatmul.f32.vlgmr.msra.gmra.mxu2 %v159_v34  ;;  %546 = vmatpush.bf16.msra.mxu3 %v2431_v38 }
  0x26   :  { %575 = vmatpush.bf16.msrb.mxu2 %v2462_v29  ;;  %511 = vmatmul.f32.vlgmr.msra.gmra.mxu0 %v157_v37  ;;  %v2471_v29 = vld [vmem:[#allocation4 + $0x200] sm:$0xff] }
  0x27   :  { %551 = vmatpush.bf16.msrb.mxu0 %v2446_v30  ;;  %523 = vmatmul.f32.vlgmr.msra.gmra.mxu1 %v158_v40  ;;  %v605_v30 = vperm.slane %v165_v8, 1 }
  0x28   :  { %563 = vmatpush.bf16.msrb.mxu1 %v2454_v33  ;;  %547 = vmatmul.f32.vlgmr.msra.gmra.mxu3 %v160_v45 }
  0x29   :  { %654 = vmatpush.bf16.msrb.mxu3 %v2470_v41 }
  0x2a   :  { %576 = vmatpush.bf16.msrb.mxu2 %v2461_v35 }
  0x2b   :  { %552 = vmatpush.bf16.msrb.mxu0 %v2445_v36  ;;  %v677_v36 = vld [vmem:[%s2739_s2] sm:$0x2] }
  0x2c   :  { %564 = vmatpush.bf16.msrb.mxu1 %v2453_v39  ;;  %v678_v37 = vunpack.c.l.bf16 %v677_v36 }
  0x2d   :  { %655 = vmatpush.bf16.msrb.mxu3 %v2469_v46 }
  0x2e   :  { %577 = vmatpush.bf16.msrb.mxu2 %v2460_v42  ;;  %v679_v38 = vperm.slane %v678_v37, 2 }
  0x2f   :  { %553 = vmatpush.bf16.msrb.mxu0 %v2444_v43 }
  0x30   :  { %565 = vmatpush.bf16.msrb.mxu1 %v2452_v44 }
  0x31   :  { %656 = vmatpush.bf16.msrb.mxu3 %v2468_v50 }
  0x32   :  { %578 = vmatpush.bf16.msrb.mxu2 %v2459_v47 }
  0x33   :  { %554 = vmatpush.bf16.msrb.mxu0 %v2443_v48 }
  0x34   :  { %566 = vmatpush.bf16.msrb.mxu1 %v2451_v49 }
  0x35   :  { %657 = vmatpush.bf16.msrb.mxu3 %v2467_v2 }
  0x36   :  { %579 = vmatpush.bf16.msrb.mxu2 %v2458_v51 }
  0x37   :  { %555 = vmatpush.bf16.msrb.mxu0 %v2442_v52 }
  0x38   :  { %567 = vmatpush.bf16.msrb.mxu1 %v2450_v53 }
  0x39   :  { %658 = vmatpush.bf16.msrb.mxu3 %v2466_v3 }
  0x3a   :  { %580 = vmatpush.bf16.msrb.mxu2 %v2457_v54 }
  0x3b   :  { %556 = vmatpush.bf16.msrb.mxu0 %v2441_v55 }
  0x3c   :  { %568 = vmatpush.bf16.msrb.mxu1 %v2449_v56 }
  0x3d   :  { %659 = vmatpush.bf16.msrb.mxu3 %v2465_v4 }
  0x3e   :  { %581 = vmatpush.bf16.msrb.mxu2 %v2456_v57 }
  0x3f   :  { %557 = vmatpush.bf16.msrb.mxu0 %v2440_v58 }
  0x40   :  { %569 = vmatpush.bf16.msrb.mxu1 %v2448_v59 }
  0x41   :  { %660 = vmatpush.bf16.msrb.mxu3 %v2464_v5 }
  0x42   :  { %582 = vmatpush.bf16.msrb.mxu2 %v2455_v60 }
  0x43   :  { %558 = vmatpush.bf16.msrb.mxu0 %v2439_v61 }
  0x44   :  { %570 = vmatpush.bf16.msrb.mxu1 %v2447_v62 }
  0x45   :  { %583 = vmatmul.f32.vlgmr.msrb.gmra.mxu2 %v163_v63  ;;  %661 = vmatpush.bf16.msrb.mxu3 %v2463_v7 }
  0x46   :  { %559 = vmatmul.f32.vlgmr.msrb.gmra.mxu0 %v161_v0 }
  0x47   :  { %571 = vmatmul.f32.vlgmr.msrb.gmra.mxu1 %v162_v1  ;;  %712 = vmatpush.bf16.msra.mxu0 %v2474_v10 }
  0x4b   :  { %713 = vmatpush.bf16.msra.mxu0 %v2473_v12 }
  0x4f   :  { %714 = vmatpush.bf16.msra.mxu0 %v2472_v28 }
  0x53   :  { %715 = vmatpush.bf16.msra.mxu0 %v2471_v29 }
  0xa3   :  { %v512_v11 = vpop.f32.mrf.mxu0 }
  0xa4   :  { %v513_v13 = vadd.f32 %v512_v11, %v166_v9  ;;  %v524_v14 = vpop.f32.mrf.mxu1 }
  0xa6   :  { %v525_v15 = vadd.f32 %v524_v14, %v513_v13 }
  0xa8   :  { %v536_v16 = vpop.f32.mrf.mxu2 }
  0xa9   :  { %v537_v17 = vadd.f32 %v536_v16, %v525_v15 }
  0xab   :  { %v548_v18 = vpop.f32.mrf.mxu3 }
  0xac   :  { %v549_v19 = vadd.f32 %v548_v18, %v537_v17 }
  0xc3   :  { %v560_v20 = vpop.f32.mrf.mxu0 }
  0xc4   :  { %v561_v21 = vadd.f32 %v560_v20, %v549_v19  ;;  %v572_v22 = vpop.f32.mrf.mxu1 }
  0xc6   :  { %v573_v23 = vadd.f32 %v572_v22, %v561_v21 }
  0xc8   :  { %v584_v24 = vpop.f32.mrf.mxu2 }
  0xc9   :  { %v585_v25 = vadd.f32 %v584_v24, %v573_v23 }
  0xcb   :  { %v587_v26 = vmax.f32 %v585_v25, 0.0 }
  0xcd   :  { %v604_v27 = vpack.c.bf16 %v587_v26, %v587_v26 }
  0xcf   :  { %662 = vmatmul.bf16.vlgmr.msrb.gmra.mxu3 %v604_v27 }
 0x152   :  { %v663_v31 = vpop.f32.mrf.mxu3 }
 0x153   :  { %v664_v32 = vadd.f32 %v663_v31, %v605_v30 }
 0x155   :  { %v667_v33 = vmax.f32 %v664_v32, 0.0 }
 0x157   :  { %v676_v34 = vpack.c.bf16 %v667_v33, %v667_v33 }
 0x159   :  { %2126 = vmatmul.msk.bf16.vlgmr.msra.gmra.mxu0 %vm704_vm0, %v676_v34 }
 0x15a   :  { %v665_v35 = vpop.f32.mrf.mxu3 }
 0x1d6   :  { %v717_v39 = vpop.f32.mrf.mxu0 }
 0x1d7   :  { %v718_v40 = vadd.f32 %v717_v39, %v679_v38 }
 0x1de   :  { %v719_v41 = vpop.f32.mrf.mxu0 }
 0x1df   :  { %2591 = dma.done.wait [#allocation3], 7936 }
 0x1e0   :  { %2592 = vsyncadd [#allocation3], 4294959360  ;;  %v2476_v42 = vld [vmem:[#allocation2 + $0x8] sm:$0xff]  ;;  %v2475_v43 = vld [vmem:[#allocation2] sm:$0xff]  ;;  %v731_v44 = vpack.c.bf16 %v718_v40, %v718_v40  ;;  %vm745_vm1 = vcmask 261120  }
 0x1e1   :  { %755 = vmatpush.bf16.msra.mxu1 %v2476_v42  ;;  %v2478_v45 = vld [vmem:[#allocation2 + $0x18] sm:$0xff]  ;;  %v2477_v46 = vld [vmem:[#allocation2 + $0x10] sm:$0xff]  ;;  %v729_v47 = vld [vmem:[%s2739_s2] sm:$0x2] }
 0x1e2   :  { %792 = vmatpush.bf16.msra.mxu2 %v2478_v45  ;;  %v730_v48 = vunpack.c.l.bf16 %v729_v47  ;;  %v2480_v55 = vld [vmem:[#allocation2 + $0x28] sm:$0xff]  ;;  %v2479_v56 = vld [vmem:[#allocation2 + $0x20] sm:$0xff]  ;;  %v2482_v57 = vld [vmem:[#allocation2 + $0x38] sm:$0xff] }
 0x1e3   :  { %827 = vmatpush.bf16.msra.mxu3 %v2480_v55  ;;  %v2481_v58 = vld [vmem:[#allocation2 + $0x30] sm:$0xff]  ;;  %v767_v59 = vld [vmem:[%s2739_s2] sm:$0x4]  ;;  %v2484_v3 = vld [vmem:[#allocation2 + $0x48] sm:$0xff] }
 0x1e4   :  { %v732_v49 = vperm.slane %v730_v48, 3  ;;  %v768_v60 = vunpack.c.l.bf16 %v767_v59  ;;  %v2483_v4 = vld [vmem:[#allocation2 + $0x40] sm:$0xff]  ;;  %v2486_v19 = vld [vmem:[#allocation2 + $0x58] sm:$0xff]  ;;  %v2485_v20 = vld [vmem:[#allocation2 + $0x50] sm:$0xff] }
 0x1e5   :  { %756 = vmatpush.bf16.msra.mxu1 %v2475_v43  ;;  %v839_v11 = vld [vmem:[%s2739_s2] sm:$0x8]  ;;  %936 = vmatpush.bf16.msrb.mxu0 %v2486_v19  ;;  %v2488_v21 = vld [vmem:[#allocation2 + $0x68] sm:$0xff]  ;;  %v2490_v29 = vld [vmem:[#allocation2 + $0x78] sm:$0xff] }
 0x1e6   :  { %793 = vmatpush.bf16.msra.mxu2 %v2477_v46  ;;  %v770_v61 = vperm.slane %v768_v60, 4  ;;  %v805_v5 = vperm.slane %v768_v60, 5  ;;  %v840_v12 = vunpack.c.l.bf16 %v839_v11  ;;  %v2487_v22 = vld [vmem:[#allocation2 + $0x60] sm:$0xff]  ;;  %v2489_v30 = vld [vmem:[#allocation2 + $0x70] sm:$0xff]  ;;  %v2492_v39 = vld [vmem:[#allocation2 + $0x88] sm:$0xff] }
 0x1e7   :  { %828 = vmatpush.bf16.msra.mxu3 %v2479_v56  ;;  %v911_v31 = vld [vmem:[%s2739_s2 + $0x4] sm:$0x1]  ;;  %v2494_v47 = vld [vmem:[#allocation2 + $0x98] sm:$0xff]  ;;  %v2493_v48 = vld [vmem:[#allocation2 + $0x90] sm:$0xff] }
 0x1e8   :  { %2135 = vmatmul.msk.bf16.vlgmr.msra.gmra.mxu1 %vm745_vm1, %v731_v44  ;;  %v842_v13 = vperm.slane %v840_v12, 6  ;;  %v877_v23 = vperm.slane %v840_v12, 7  ;;  %v912_v32 = vunpack.c.l.bf16 %v911_v31  ;;  %v2491_v40 = vld [vmem:[#allocation2 + $0x80] sm:$0xff]  ;;  %v2500_v11 = vld [vmem:[#allocation2 + $0xc8] sm:$0xff]  ;;  %v2502_v19 = vld [vmem:[#allocation2 + $0xd8] sm:$0xff] }
 0x1e9   :  { %864 = vmatpush.bf16.msrb.mxu1 %v2482_v57  ;;  %937 = vmatpush.bf16.msrb.mxu0 %v2485_v20  ;;  %v2496_v57 = vld [vmem:[#allocation2 + $0xa8] sm:$0xff]  ;;  %v2499_v12 = vld [vmem:[#allocation2 + $0xc0] sm:$0xff]  ;;  %v2501_v20 = vld [vmem:[#allocation2 + $0xd0] sm:$0xff] }
 0x1ea   :  { %899 = vmatpush.bf16.msrb.mxu2 %v2484_v3  ;;  %v914_v33 = vperm.slane %v912_v32, 0  ;;  %v949_v41 = vperm.slane %v912_v32, 1  ;;  %v1055_v3 = vld [vmem:[%s2739_s2 + $0x4] sm:$0x4] }
 0x1eb   :  { %971 = vmatpush.bf16.msrb.mxu3 %v2488_v21  ;;  %v1127_v21 = vld [vmem:[%s2739_s2 + $0x4] sm:$0x8] }
 0x1ed   :  { %865 = vmatpush.bf16.msrb.mxu1 %v2481_v58  ;;  %1080 = vmatpush.bf16.msra.mxu0 %v2494_v47  ;;  %v2495_v58 = vld [vmem:[#allocation2 + $0xa0] sm:$0xff]  ;;  %v2508_v47 = vld [vmem:[#allocation2 + $0x108] sm:$0xff] }
 0x1ee   :  { %900 = vmatpush.bf16.msrb.mxu2 %v2483_v4  ;;  %v1056_v4 = vunpack.c.l.bf16 %v1055_v3 }
 0x1ef   :  { %972 = vmatpush.bf16.msrb.mxu3 %v2487_v22  ;;  %v1128_v22 = vunpack.c.l.bf16 %v1127_v21 }
 0x1f1   :  { %1008 = vmatpush.bf16.msra.mxu1 %v2490_v29  ;;  %1081 = vmatpush.bf16.msra.mxu0 %v2493_v48  ;;  %v2504_v29 = vld [vmem:[#allocation2 + $0xe8] sm:$0xff]  ;;  %v1165_v31 = vperm.slane %v1128_v22, 7  ;;  %v2507_v48 = vld [vmem:[#allocation2 + $0x100] sm:$0xff] }
 0x1f5   :  { %1009 = vmatpush.bf16.msra.mxu1 %v2489_v30  ;;  %v2503_v30 = vld [vmem:[#allocation2 + $0xe0] sm:$0xff] }
 0x265   :  { %v758_v50 = vpop.f32.mrf.mxu1 }
 0x266   :  { %v759_v51 = vadd.f32 %v758_v50, %v732_v49  ;;  %v983_v49 = vld [vmem:[%s2739_s2 + $0x4] sm:$0x2] }
 0x267   :  { %v984_v50 = vunpack.c.l.bf16 %v983_v49 }
 0x268   :  { %v762_v52 = vmax.f32 %v759_v51, 0.0 }
 0x269   :  { %v986_v51 = vperm.slane %v984_v50, 2  ;;  %v1021_v59 = vperm.slane %v984_v50, 3 }
 0x26a   :  { %v769_v53 = vpack.c.bf16 %v762_v52, %v762_v52 }
 0x26c   :  { %2144 = vmatmul.msk.bf16.vlgmr.msra.gmra.mxu2 %vm745_vm1, %v769_v53 }
 0x26d   :  { %v760_v54 = vpop.f32.mrf.mxu1  ;;  %1043 = vmatpush.bf16.msra.mxu2 %v2492_v39  ;;  %v1199_v39 = vld [vmem:[%s2739_s2 + $0x8] sm:$0x1] }
 0x271   :  { %1044 = vmatpush.bf16.msra.mxu2 %v2491_v40  ;;  %v1200_v40 = vunpack.c.l.bf16 %v1199_v39 }
 0x273   :  { %v1237_v49 = vperm.slane %v1200_v40, 1 }
 0x2ef   :  { %v795_v62 = vpop.f32.mrf.mxu2 }
 0x2f0   :  { %v796_v63 = vadd.f32 %v795_v62, %v770_v61 }
 0x2f2   :  { %v799_v0 = vmax.f32 %v796_v63, 0.0 }
 0x2f4   :  { %v804_v1 = vpack.c.bf16 %v799_v0, %v799_v0 }
 0x2f6   :  { %2153 = vmatmul.msk.bf16.vlgmr.msra.gmra.mxu3 %vm745_vm1, %v804_v1  ;;  %v2498_v1 = vld [vmem:[#allocation2 + $0xb8] sm:$0xff] }
 0x2f7   :  { %v797_v2 = vpop.f32.mrf.mxu2  ;;  %1115 = vmatpush.bf16.msra.mxu3 %v2496_v57  ;;  %v1271_v57 = vld [vmem:[%s2739_s2 + $0x8] sm:$0x2] }
 0x2f8   :  { %v2497_v2 = vld [vmem:[#allocation2 + $0xb0] sm:$0xff] }
 0x2fb   :  { %1116 = vmatpush.bf16.msra.mxu3 %v2495_v58  ;;  %v1272_v58 = vunpack.c.l.bf16 %v1271_v57 }
 0x2fd   :  { %v1309_v3 = vperm.slane %v1272_v58, 3 }
 0x379   :  { %v830_v6 = vpop.f32.mrf.mxu3 }
 0x37a   :  { %v831_v7 = vadd.f32 %v830_v6, %v805_v5  ;;  %v1058_v5 = vperm.slane %v1056_v4, 4 }
 0x37c   :  { %v834_v8 = vmax.f32 %v831_v7, 0.0 }
 0x37e   :  { %v841_v9 = vpack.c.bf16 %v834_v8, %v834_v8 }
 0x380   :  { %2162 = vmatmul.msk.bf16.vlgmr.msrb.gmra.mxu1 %vm745_vm1, %v841_v9 }
 0x381   :  { %v832_v10 = vpop.f32.mrf.mxu3  ;;  %1152 = vmatpush.bf16.msrb.mxu1 %v2498_v1  ;;  %v2512_v1 = vld [vmem:[#allocation2 + $0x128] sm:$0xff] }
 0x385   :  { %1153 = vmatpush.bf16.msrb.mxu1 %v2497_v2  ;;  %v2511_v2 = vld [vmem:[#allocation2 + $0x120] sm:$0xff] }
 0x3fd   :  { %v867_v14 = vpop.f32.mrf.mxu1 }
 0x3fe   :  { %v868_v15 = vadd.f32 %v867_v14, %v842_v13  ;;  %v1093_v13 = vperm.slane %v1056_v4, 5 }
 0x400   :  { %v871_v16 = vmax.f32 %v868_v15, 0.0 }
 0x402   :  { %v876_v17 = vpack.c.bf16 %v871_v16, %v871_v16 }
 0x404   :  { %2171 = vmatmul.msk.bf16.vlgmr.msrb.gmra.mxu2 %vm745_vm1, %v876_v17 }
 0x405   :  { %v869_v18 = vpop.f32.mrf.mxu1  ;;  %1187 = vmatpush.bf16.msrb.mxu2 %v2500_v11  ;;  %v1343_v11 = vld [vmem:[%s2739_s2 + $0x8] sm:$0x4] }
 0x409   :  { %1188 = vmatpush.bf16.msrb.mxu2 %v2499_v12  ;;  %v1344_v12 = vunpack.c.l.bf16 %v1343_v11 }
 0x40b   :  { %v1381_v21 = vperm.slane %v1344_v12, 5 }
 0x487   :  { %v902_v24 = vpop.f32.mrf.mxu2 }
 0x488   :  { %v903_v25 = vadd.f32 %v902_v24, %v877_v23  ;;  %v1130_v23 = vperm.slane %v1128_v22, 6 }
 0x48a   :  { %v906_v26 = vmax.f32 %v903_v25, 0.0 }
 0x48c   :  { %v913_v27 = vpack.c.bf16 %v906_v26, %v906_v26 }
 0x48e   :  { %2180 = vmatmul.msk.bf16.vlgmr.msrb.gmra.mxu0 %vm745_vm1, %v913_v27 }
 0x48f   :  { %v904_v28 = vpop.f32.mrf.mxu2  ;;  %1224 = vmatpush.bf16.msrb.mxu0 %v2502_v19  ;;  %v2516_v19 = vld [vmem:[#allocation2 + $0x148] sm:$0xff] }
 0x493   :  { %1225 = vmatpush.bf16.msrb.mxu0 %v2501_v20  ;;  %v2515_v20 = vld [vmem:[#allocation2 + $0x140] sm:$0xff] }
 0x50b   :  { %v939_v34 = vpop.f32.mrf.mxu0 }
 0x50c   :  { %v940_v35 = vadd.f32 %v939_v34, %v914_v33 }
 0x50e   :  { %v943_v36 = vmax.f32 %v940_v35, 0.0 }
 0x510   :  { %v948_v37 = vpack.c.bf16 %v943_v36, %v943_v36 }
 0x512   :  { %2189 = vmatmul.msk.bf16.vlgmr.msrb.gmra.mxu3 %vm745_vm1, %v948_v37  ;;  %v2506_v37 = vld [vmem:[#allocation2 + $0xf8] sm:$0xff] }
 0x513   :  { %v941_v38 = vpop.f32.mrf.mxu0  ;;  %1259 = vmatpush.bf16.msrb.mxu3 %v2504_v29  ;;  %v1415_v29 = vld [vmem:[%s2739_s2 + $0x8] sm:$0x8] }
 0x514   :  { %v2505_v38 = vld [vmem:[#allocation2 + $0xf0] sm:$0xff] }
 0x517   :  { %1260 = vmatpush.bf16.msrb.mxu3 %v2503_v30  ;;  %v1416_v30 = vunpack.c.l.bf16 %v1415_v29 }
 0x519   :  { %v1453_v39 = vperm.slane %v1416_v30, 7 }
 0x595   :  { %v974_v42 = vpop.f32.mrf.mxu3 }
 0x596   :  { %v975_v43 = vadd.f32 %v974_v42, %v949_v41  ;;  %v1202_v41 = vperm.slane %v1200_v40, 0 }
 0x598   :  { %v978_v44 = vmax.f32 %v975_v43, 0.0 }
 0x59a   :  { %v985_v45 = vpack.c.bf16 %v978_v44, %v978_v44 }
 0x59c   :  { %2198 = vmatmul.msk.bf16.vlgmr.msra.gmra.mxu1 %vm745_vm1, %v985_v45 }
 0x59d   :  { %v976_v46 = vpop.f32.mrf.mxu3  ;;  %1296 = vmatpush.bf16.msra.mxu1 %v2506_v37  ;;  %v2520_v37 = vld [vmem:[#allocation2 + $0x168] sm:$0xff] }
 0x5a1   :  { %1297 = vmatpush.bf16.msra.mxu1 %v2505_v38  ;;  %v2519_v38 = vld [vmem:[#allocation2 + $0x160] sm:$0xff] }
 0x619   :  { %v1011_v52 = vpop.f32.mrf.mxu1 }
 0x61a   :  { %v1012_v53 = vadd.f32 %v1011_v52, %v986_v51 }
 0x61c   :  { %v1015_v54 = vmax.f32 %v1012_v53, 0.0 }
 0x61e   :  { %v1020_v55 = vpack.c.bf16 %v1015_v54, %v1015_v54 }
 0x620   :  { %2207 = vmatmul.msk.bf16.vlgmr.msra.gmra.mxu2 %vm745_vm1, %v1020_v55  ;;  %v2510_v55 = vld [vmem:[#allocation2 + $0x118] sm:$0xff] }
 0x621   :  { %v1013_v56 = vpop.f32.mrf.mxu1  ;;  %1331 = vmatpush.bf16.msra.mxu2 %v2508_v47  ;;  %v1487_v47 = vld [vmem:[%s2739_s2 + $0xc] sm:$0x1] }
 0x622   :  { %v2509_v56 = vld [vmem:[#allocation2 + $0x110] sm:$0xff] }
 0x625   :  { %1332 = vmatpush.bf16.msra.mxu2 %v2507_v48  ;;  %v1488_v48 = vunpack.c.l.bf16 %v1487_v47 }
 0x627   :  { %v1525_v57 = vperm.slane %v1488_v48, 1 }
 0x6a3   :  { %v1046_v60 = vpop.f32.mrf.mxu2 }
 0x6a4   :  { %v1047_v61 = vadd.f32 %v1046_v60, %v1021_v59  ;;  %v1274_v59 = vperm.slane %v1272_v58, 2 }
 0x6a6   :  { %v1050_v62 = vmax.f32 %v1047_v61, 0.0 }
 0x6a8   :  { %v1057_v63 = vpack.c.bf16 %v1050_v62, %v1050_v62 }
 0x6aa   :  { %2216 = vmatmul.msk.bf16.vlgmr.msra.gmra.mxu0 %vm745_vm1, %v1057_v63 }
 0x6ab   :  { %v1048_v0 = vpop.f32.mrf.mxu2  ;;  %1368 = vmatpush.bf16.msra.mxu0 %v2510_v55  ;;  %v2524_v55 = vld [vmem:[#allocation2 + $0x188] sm:$0xff] }
 0x6af   :  { %1369 = vmatpush.bf16.msra.mxu0 %v2509_v56  ;;  %v2523_v56 = vld [vmem:[#allocation2 + $0x180] sm:$0xff] }
 0x727   :  { %v1083_v6 = vpop.f32.mrf.mxu0 }
 0x728   :  { %v1084_v7 = vadd.f32 %v1083_v6, %v1058_v5 }
 0x72a   :  { %v1087_v8 = vmax.f32 %v1084_v7, 0.0 }
 0x72c   :  { %v1092_v9 = vpack.c.bf16 %v1087_v8, %v1087_v8 }
 0x72e   :  { %2225 = vmatmul.msk.bf16.vlgmr.msra.gmra.mxu3 %vm745_vm1, %v1092_v9  ;;  %v2514_v9 = vld [vmem:[#allocation2 + $0x138] sm:$0xff] }
 0x72f   :  { %v1085_v10 = vpop.f32.mrf.mxu0  ;;  %1403 = vmatpush.bf16.msra.mxu3 %v2512_v1  ;;  %v1559_v1 = vld [vmem:[%s2739_s2 + $0xc] sm:$0x2] }
 0x730   :  { %v2513_v10 = vld [vmem:[#allocation2 + $0x130] sm:$0xff] }
 0x733   :  { %1404 = vmatpush.bf16.msra.mxu3 %v2511_v2  ;;  %v1560_v2 = vunpack.c.l.bf16 %v1559_v1 }
 0x735   :  { %v1597_v11 = vperm.slane %v1560_v2, 3 }
 0x7b1   :  { %v1118_v14 = vpop.f32.mrf.mxu3 }
 0x7b2   :  { %v1119_v15 = vadd.f32 %v1118_v14, %v1093_v13  ;;  %v1346_v13 = vperm.slane %v1344_v12, 4 }
 0x7b4   :  { %v1122_v16 = vmax.f32 %v1119_v15, 0.0 }
 0x7b6   :  { %v1129_v17 = vpack.c.bf16 %v1122_v16, %v1122_v16 }
 0x7b8   :  { %2234 = vmatmul.msk.bf16.vlgmr.msrb.gmra.mxu1 %vm745_vm1, %v1129_v17 }
 0x7b9   :  { %v1120_v18 = vpop.f32.mrf.mxu3  ;;  %1440 = vmatpush.bf16.msrb.mxu1 %v2514_v9  ;;  %v2528_v9 = vld [vmem:[#allocation2 + $0x1a8] sm:$0xff] }
 0x7bd   :  { %1441 = vmatpush.bf16.msrb.mxu1 %v2513_v10  ;;  %v2527_v10 = vld [vmem:[#allocation2 + $0x1a0] sm:$0xff] }
 0x835   :  { %v1155_v24 = vpop.f32.mrf.mxu1 }
 0x836   :  { %v1156_v25 = vadd.f32 %v1155_v24, %v1130_v23 }
 0x838   :  { %v1159_v26 = vmax.f32 %v1156_v25, 0.0 }
 0x83a   :  { %v1164_v27 = vpack.c.bf16 %v1159_v26, %v1159_v26 }
 0x83c   :  { %2243 = vmatmul.msk.bf16.vlgmr.msrb.gmra.mxu2 %vm745_vm1, %v1164_v27  ;;  %v2518_v27 = vld [vmem:[#allocation2 + $0x158] sm:$0xff] }
 0x83d   :  { %v1157_v28 = vpop.f32.mrf.mxu1  ;;  %1475 = vmatpush.bf16.msrb.mxu2 %v2516_v19  ;;  %v1631_v19 = vld [vmem:[%s2739_s2 + $0xc] sm:$0x4] }
 0x83e   :  { %v2517_v28 = vld [vmem:[#allocation2 + $0x150] sm:$0xff] }
 0x841   :  { %1476 = vmatpush.bf16.msrb.mxu2 %v2515_v20  ;;  %v1632_v20 = vunpack.c.l.bf16 %v1631_v19 }
 0x843   :  { %v1669_v29 = vperm.slane %v1632_v20, 5 }
 0x8bf   :  { %v1190_v32 = vpop.f32.mrf.mxu2 }
 0x8c0   :  { %v1191_v33 = vadd.f32 %v1190_v32, %v1165_v31  ;;  %v1418_v31 = vperm.slane %v1416_v30, 6 }
 0x8c2   :  { %v1194_v34 = vmax.f32 %v1191_v33, 0.0 }
 0x8c4   :  { %v1201_v35 = vpack.c.bf16 %v1194_v34, %v1194_v34 }
 0x8c6   :  { %2252 = vmatmul.msk.bf16.vlgmr.msrb.gmra.mxu0 %vm745_vm1, %v1201_v35 }
 0x8c7   :  { %v1192_v36 = vpop.f32.mrf.mxu2  ;;  %1512 = vmatpush.bf16.msrb.mxu0 %v2518_v27  ;;  %v2532_v27 = vld [vmem:[#allocation2 + $0x1c8] sm:$0xff] }
 0x8cb   :  { %1513 = vmatpush.bf16.msrb.mxu0 %v2517_v28  ;;  %v2531_v28 = vld [vmem:[#allocation2 + $0x1c0] sm:$0xff] }
 0x943   :  { %v1227_v42 = vpop.f32.mrf.mxu0 }
 0x944   :  { %v1228_v43 = vadd.f32 %v1227_v42, %v1202_v41 }
 0x946   :  { %v1231_v44 = vmax.f32 %v1228_v43, 0.0 }
 0x948   :  { %v1236_v45 = vpack.c.bf16 %v1231_v44, %v1231_v44 }
 0x94a   :  { %2261 = vmatmul.msk.bf16.vlgmr.msrb.gmra.mxu3 %vm745_vm1, %v1236_v45  ;;  %v2522_v45 = vld [vmem:[#allocation2 + $0x178] sm:$0xff] }
 0x94b   :  { %v1229_v46 = vpop.f32.mrf.mxu0  ;;  %1547 = vmatpush.bf16.msrb.mxu3 %v2520_v37  ;;  %v1703_v37 = vld [vmem:[%s2739_s2 + $0xc] sm:$0x8] }
 0x94c   :  { %v2521_v46 = vld [vmem:[#allocation2 + $0x170] sm:$0xff] }
 0x94f   :  { %1548 = vmatpush.bf16.msrb.mxu3 %v2519_v38  ;;  %v1704_v38 = vunpack.c.l.bf16 %v1703_v37 }
 0x951   :  { %v1741_v47 = vperm.slane %v1704_v38, 7 }
 0x9cd   :  { %v1262_v50 = vpop.f32.mrf.mxu3 }
 0x9ce   :  { %v1263_v51 = vadd.f32 %v1262_v50, %v1237_v49  ;;  %v1490_v49 = vperm.slane %v1488_v48, 0 }
 0x9d0   :  { %v1266_v52 = vmax.f32 %v1263_v51, 0.0 }
 0x9d2   :  { %v1273_v53 = vpack.c.bf16 %v1266_v52, %v1266_v52 }
 0x9d4   :  { %2270 = vmatmul.msk.bf16.vlgmr.msra.gmra.mxu1 %vm745_vm1, %v1273_v53 }
 0x9d5   :  { %v1264_v54 = vpop.f32.mrf.mxu3  ;;  %1584 = vmatpush.bf16.msra.mxu1 %v2522_v45  ;;  %v2536_v45 = vld [vmem:[#allocation2 + $0x1e8] sm:$0xff] }
 0x9d9   :  { %1585 = vmatpush.bf16.msra.mxu1 %v2521_v46  ;;  %v2535_v46 = vld [vmem:[#allocation2 + $0x1e0] sm:$0xff] }
 0xa51   :  { %v1299_v60 = vpop.f32.mrf.mxu1 }
 0xa52   :  { %v1300_v61 = vadd.f32 %v1299_v60, %v1274_v59 }
 0xa54   :  { %v1303_v62 = vmax.f32 %v1300_v61, 0.0 }
 0xa56   :  { %v1308_v63 = vpack.c.bf16 %v1303_v62, %v1303_v62 }
 0xa58   :  { %2279 = vmatmul.msk.bf16.vlgmr.msra.gmra.mxu2 %vm745_vm1, %v1308_v63  ;;  %v2526_v63 = vld [vmem:[#allocation2 + $0x198] sm:$0xff] }
 0xa59   :  { %v1301_v0 = vpop.f32.mrf.mxu1  ;;  %1619 = vmatpush.bf16.msra.mxu2 %v2524_v55 }
 0xa5a   :  { %v2525_v0 = vld [vmem:[#allocation2 + $0x190] sm:$0xff] }
 0xa5d   :  { %1620 = vmatpush.bf16.msra.mxu2 %v2523_v56 }
 0xadb   :  { %v1334_v4 = vpop.f32.mrf.mxu2 }
 0xadc   :  { %v1335_v5 = vadd.f32 %v1334_v4, %v1309_v3  ;;  %v1562_v3 = vperm.slane %v1560_v2, 2 }
 0xade   :  { %v1338_v6 = vmax.f32 %v1335_v5, 0.0 }
 0xae0   :  { %v1345_v7 = vpack.c.bf16 %v1338_v6, %v1338_v6 }
 0xae2   :  { %2288 = vmatmul.msk.bf16.vlgmr.msra.gmra.mxu0 %vm745_vm1, %v1345_v7 }
 0xae3   :  { %v1336_v8 = vpop.f32.mrf.mxu2  ;;  %1656 = vmatpush.bf16.msra.mxu0 %v2526_v63 }
 0xae7   :  { %1657 = vmatpush.bf16.msra.mxu0 %v2525_v0 }
 0xb5f   :  { %v1371_v14 = vpop.f32.mrf.mxu0 }
 0xb60   :  { %v1372_v15 = vadd.f32 %v1371_v14, %v1346_v13 }
 0xb62   :  { %v1375_v16 = vmax.f32 %v1372_v15, 0.0 }
 0xb64   :  { %v1380_v17 = vpack.c.bf16 %v1375_v16, %v1375_v16 }
 0xb66   :  { %2297 = vmatmul.msk.bf16.vlgmr.msra.gmra.mxu3 %vm745_vm1, %v1380_v17  ;;  %v2530_v17 = vld [vmem:[#allocation2 + $0x1b8] sm:$0xff] }
 0xb67   :  { %v1373_v18 = vpop.f32.mrf.mxu0  ;;  %1691 = vmatpush.bf16.msra.mxu3 %v2528_v9 }
 0xb68   :  { %v2529_v18 = vld [vmem:[#allocation2 + $0x1b0] sm:$0xff] }
 0xb6b   :  { %1692 = vmatpush.bf16.msra.mxu3 %v2527_v10 }
 0xbe9   :  { %v1406_v22 = vpop.f32.mrf.mxu3 }
 0xbea   :  { %v1407_v23 = vadd.f32 %v1406_v22, %v1381_v21  ;;  %v1634_v21 = vperm.slane %v1632_v20, 4 }
 0xbec   :  { %v1410_v24 = vmax.f32 %v1407_v23, 0.0 }
 0xbee   :  { %v1417_v25 = vpack.c.bf16 %v1410_v24, %v1410_v24 }
 0xbf0   :  { %2306 = vmatmul.msk.bf16.vlgmr.msrb.gmra.mxu1 %vm745_vm1, %v1417_v25 }
 0xbf1   :  { %v1408_v26 = vpop.f32.mrf.mxu3  ;;  %1728 = vmatpush.bf16.msrb.mxu1 %v2530_v17 }
 0xbf5   :  { %1729 = vmatpush.bf16.msrb.mxu1 %v2529_v18 }
 0xc6d   :  { %v1443_v32 = vpop.f32.mrf.mxu1 }
 0xc6e   :  { %v1444_v33 = vadd.f32 %v1443_v32, %v1418_v31 }
 0xc70   :  { %v1447_v34 = vmax.f32 %v1444_v33, 0.0 }
 0xc72   :  { %v1452_v35 = vpack.c.bf16 %v1447_v34, %v1447_v34 }
 0xc74   :  { %2315 = vmatmul.msk.bf16.vlgmr.msrb.gmra.mxu2 %vm745_vm1, %v1452_v35  ;;  %v2534_v35 = vld [vmem:[#allocation2 + $0x1d8] sm:$0xff] }
 0xc75   :  { %v1445_v36 = vpop.f32.mrf.mxu1  ;;  %1763 = vmatpush.bf16.msrb.mxu2 %v2532_v27 }
 0xc76   :  { %v2533_v36 = vld [vmem:[#allocation2 + $0x1d0] sm:$0xff] }
 0xc79   :  { %1764 = vmatpush.bf16.msrb.mxu2 %v2531_v28 }
 0xcf7   :  { %v1478_v40 = vpop.f32.mrf.mxu2 }
 0xcf8   :  { %v1479_v41 = vadd.f32 %v1478_v40, %v1453_v39  ;;  %v1706_v39 = vperm.slane %v1704_v38, 6 }
 0xcfa   :  { %v1482_v42 = vmax.f32 %v1479_v41, 0.0 }
 0xcfc   :  { %v1489_v43 = vpack.c.bf16 %v1482_v42, %v1482_v42 }
 0xcfe   :  { %2324 = vmatmul.msk.bf16.vlgmr.msrb.gmra.mxu0 %vm745_vm1, %v1489_v43 }
 0xcff   :  { %v1480_v44 = vpop.f32.mrf.mxu2  ;;  %1800 = vmatpush.bf16.msrb.mxu0 %v2534_v35 }
 0xd03   :  { %1801 = vmatpush.bf16.msrb.mxu0 %v2533_v36 }
 0xd7b   :  { %v1515_v50 = vpop.f32.mrf.mxu0 }
 0xd7c   :  { %v1516_v51 = vadd.f32 %v1515_v50, %v1490_v49 }
 0xd7e   :  { %v1519_v52 = vmax.f32 %v1516_v51, 0.0 }
 0xd80   :  { %v1524_v53 = vpack.c.bf16 %v1519_v52, %v1519_v52 }
 0xd82   :  { %2333 = vmatmul.msk.bf16.vlgmr.msrb.gmra.mxu3 %vm745_vm1, %v1524_v53  ;;  %v1775_v53 = vld [vmem:[%s2739_s2 + $0x10] sm:$0x1] }
 0xd83   :  { %v1517_v54 = vpop.f32.mrf.mxu0  ;;  %1835 = vmatpush.bf16.msrb.mxu3 %v2536_v45 }
 0xd84   :  { %v1776_v54 = vunpack.c.l.bf16 %v1775_v53 }
 0xd86   :  { %v1778_v55 = vperm.slane %v1776_v54, 0 }
 0xd87   :  { %1836 = vmatpush.bf16.msrb.mxu3 %v2535_v46 }
 0xe05   :  { %v1550_v58 = vpop.f32.mrf.mxu3 }
 0xe06   :  { %v1551_v59 = vadd.f32 %v1550_v58, %v1525_v57 }
 0xe08   :  { %v1554_v60 = vmax.f32 %v1551_v59, 0.0 }
 0xe0a   :  { %v1561_v61 = vpack.c.bf16 %v1554_v60, %v1554_v60 }
 0xe0c   :  { %2342 = vmatmul.msk.bf16.vlgmr.msra.gmra.mxu1 %vm745_vm1, %v1561_v61  ;;  %v1813_v61 = vperm.slane %v1776_v54, 1 }
 0xe0d   :  { %v1552_v62 = vpop.f32.mrf.mxu3 }
 0xe89   :  { %v1587_v4 = vpop.f32.mrf.mxu1 }
 0xe8a   :  { %v1588_v5 = vadd.f32 %v1587_v4, %v1562_v3 }
 0xe8c   :  { %v1591_v6 = vmax.f32 %v1588_v5, 0.0 }
 0xe8e   :  { %v1596_v7 = vpack.c.bf16 %v1591_v6, %v1591_v6 }
 0xe90   :  { %2351 = vmatmul.msk.bf16.vlgmr.msra.gmra.mxu2 %vm745_vm1, %v1596_v7 }
 0xe91   :  { %v1589_v8 = vpop.f32.mrf.mxu1 }
 0xf13   :  { %v1622_v12 = vpop.f32.mrf.mxu2 }
 0xf14   :  { %v1623_v13 = vadd.f32 %v1622_v12, %v1597_v11 }
 0xf16   :  { %v1626_v14 = vmax.f32 %v1623_v13, 0.0 }
 0xf18   :  { %v1633_v15 = vpack.c.bf16 %v1626_v14, %v1626_v14 }
 0xf1a   :  { %2360 = vmatmul.msk.bf16.vlgmr.msra.gmra.mxu0 %vm745_vm1, %v1633_v15 }
 0xf1b   :  { %v1624_v16 = vpop.f32.mrf.mxu2 }
 0xf97   :  { %v1659_v22 = vpop.f32.mrf.mxu0 }
 0xf98   :  { %v1660_v23 = vadd.f32 %v1659_v22, %v1634_v21 }
 0xf9a   :  { %v1663_v24 = vmax.f32 %v1660_v23, 0.0 }
 0xf9c   :  { %v1668_v25 = vpack.c.bf16 %v1663_v24, %v1663_v24 }
 0xf9e   :  { %2369 = vmatmul.msk.bf16.vlgmr.msra.gmra.mxu3 %vm745_vm1, %v1668_v25 }
 0xf9f   :  { %v1661_v26 = vpop.f32.mrf.mxu0 }
0x1021   :  { %v1694_v30 = vpop.f32.mrf.mxu3 }
0x1022   :  { %v1695_v31 = vadd.f32 %v1694_v30, %v1669_v29 }
0x1024   :  { %v1698_v32 = vmax.f32 %v1695_v31, 0.0 }
0x1026   :  { %v1705_v33 = vpack.c.bf16 %v1698_v32, %v1698_v32 }
0x1028   :  { %2378 = vmatmul.msk.bf16.vlgmr.msrb.gmra.mxu1 %vm745_vm1, %v1705_v33 }
0x1029   :  { %v1696_v34 = vpop.f32.mrf.mxu3 }
0x10a5   :  { %v1731_v40 = vpop.f32.mrf.mxu1 }
0x10a6   :  { %v1732_v41 = vadd.f32 %v1731_v40, %v1706_v39 }
0x10a8   :  { %v1735_v42 = vmax.f32 %v1732_v41, 0.0 }
0x10aa   :  { %v1740_v43 = vpack.c.bf16 %v1735_v42, %v1735_v42 }
0x10ac   :  { %2387 = vmatmul.msk.bf16.vlgmr.msrb.gmra.mxu2 %vm745_vm1, %v1740_v43 }
0x10ad   :  { %v1733_v44 = vpop.f32.mrf.mxu1 }
0x112f   :  { %v1766_v48 = vpop.f32.mrf.mxu2 }
0x1130   :  { %v1767_v49 = vadd.f32 %v1766_v48, %v1741_v47 }
0x1132   :  { %v1770_v50 = vmax.f32 %v1767_v49, 0.0 }
0x1134   :  { %v1777_v51 = vpack.c.bf16 %v1770_v50, %v1770_v50 }
0x1136   :  { %2396 = vmatmul.msk.bf16.vlgmr.msrb.gmra.mxu0 %vm745_vm1, %v1777_v51 }
0x1137   :  { %v1768_v52 = vpop.f32.mrf.mxu2 }
0x11b3   :  { %v1803_v56 = vpop.f32.mrf.mxu0 }
0x11b4   :  { %v1804_v57 = vadd.f32 %v1803_v56, %v1778_v55 }
0x11b6   :  { %v1807_v58 = vmax.f32 %v1804_v57, 0.0 }
0x11b8   :  { %v1812_v59 = vpack.c.bf16 %v1807_v58, %v1807_v58 }
0x11ba   :  { %2405 = vmatmul.msk.bf16.vlgmr.msrb.gmra.mxu3 %vm745_vm1, %v1812_v59 }
0x11bb   :  { %v1805_v60 = vpop.f32.mrf.mxu0 }
0x123d   :  { %v1838_v62 = vpop.f32.mrf.mxu3 }
0x123e   :  { %v1839_v63 = vadd.f32 %v1838_v62, %v1813_v61 }
0x1240   :  { %1842 = vst [vmem:[%s2741_s4] sm:$0xff] %v1839_v63 }
0x1245   :  { %v1840_v0 = vpop.f32.mrf.mxu3 }
0x1246   :  { %1847 = vsyncpa [#allocation5], 1 }
0x1247   :  { %1848 = vsyncmov [#allocation3] }
0x124a   :  { %s1849_s2 = vpop.sfrf %1848 }
0x124b   :  { %p2406_p0 = scmp.ne.s32.totalorder %s1849_s2, 0 }
0x124d   :  { %1853 = shalt.err (%p2406_p0)  }

</bundles_post_ra>
